<compile_context>
chip_gen: v7x
topology: tpu7x:2x2x1
jax: 0.10.0
libtpu: 0.0.40
codegen_flags: <defaults>
</compile_context>

<pallas_src>
import jax
import jax.numpy as jnp
from jax import lax
from jax.experimental import pallas as pl
from jax.experimental.pallas import tpu as pltpu

EPS = 1e-5


def add_conv1x1_bn_kernel(a_ref, b_ref, w_ref, gamma_ref, beta_ref, o_ref):
    # a_ref, b_ref : (Cin, P)    channel-major activations
    # w_ref        : (Cout, Cin) 1x1-conv weight
    # gamma/beta   : (Cout, 1)   BN affine params
    # o_ref        : (Cout, P)
    x = a_ref[...] + b_ref[...]                                   # elementwise add (VPU)
    w = w_ref[...]                                                # (Cout, Cin)
    p = x.shape[1]
    inv_p = jnp.float32(1.0 / p)

    # ---- center the inputs per channel (one cheap pass over (Cin, P)) ----
    mean_x = jnp.sum(x, axis=1, keepdims=True) * inv_p            # (Cin, 1)   XLU reduce
    xc = x - mean_x                                               # (Cin, P)

    # ---- batch variance of y = W @ x via the centered Gram matrix ----
    #   y - mean_y = W @ xc   =>   var_c = (1/P) * w_c^T (xc xc^T) w_c
    gram = lax.dot_general(xc, xc, (((1,), (1,)), ((), ())),
                           preferred_element_type=jnp.float32)    # (Cin, Cin)  tiny MXU
    wg = jnp.dot(w, gram, preferred_element_type=jnp.float32)     # (Cout, Cin) tiny MXU
    var = jnp.sum(wg * w, axis=1, keepdims=True) * inv_p          # (Cout, 1)   biased var

    # ---- fold normalization + affine into the matmul weight / bias ----
    scale = gamma_ref[...] * lax.rsqrt(var + EPS)                 # (Cout, 1)  EUP rsqrt
    bias = beta_ref[...]                                          # (Cout, 1)

    # Single pass over the large output: (scale*W)(Cout,Cin) @ xc(Cin,P) + beta
    y = jnp.dot(w * scale, xc, preferred_element_type=jnp.float32) + bias
    o_ref[...] = y.astype(o_ref.dtype)


def add_conv1x1_bn(x42, x50, weight, gamma, beta):
    """x42, x50: (N, Cin, H, W) NCHW.  weight: (Cout, Cin, 1, 1).  gamma/beta: (Cout,)."""
    N, Cin, H, W = x42.shape
    Cout = weight.shape[0]
    P = N * H * W

    # NCHW -> (Cin, N*H*W): free reshape for N == 1 (the transpose only moves a size-1 axis).
    a = jnp.transpose(x42.reshape(N, Cin, H * W), (1, 0, 2)).reshape(Cin, P)
    b = jnp.transpose(x50.reshape(N, Cin, H * W), (1, 0, 2)).reshape(Cin, P)
    w = weight.reshape(Cout, Cin)
    g = gamma.reshape(Cout, 1)
    be = beta.reshape(Cout, 1)

    flops = (2 * P * Cin * Cout      # main matmul
             + 2 * P * Cin * Cin     # centered Gram matrix
             + 2 * Cout * Cin * Cin  # W @ Gc
             + 6 * P * Cin           # add + centering
             + 2 * P * Cout)         # bias add
    bytes_accessed = 4 * (2 * P * Cin + P * Cout + Cout * Cin + 2 * Cout)

    out_flat = pl.pallas_call(
        add_conv1x1_bn_kernel,
        out_shape=jax.ShapeDtypeStruct((Cout, P), jnp.float32),
        in_specs=[pl.BlockSpec(memory_space=pltpu.MemorySpace.VMEM)] * 5,
        out_specs=pl.BlockSpec(memory_space=pltpu.MemorySpace.VMEM),
        cost_estimate=pl.CostEstimate(flops=flops,
                                      transcendentals=Cout,
                                      bytes_accessed=bytes_accessed),
    )(a, b, w, g, be)

    # (Cout, N*H*W) -> NCHW: free for N == 1.
    return jnp.transpose(out_flat.reshape(Cout, N, H, W), (1, 0, 2, 3))


def reference(x42, x50, weight, gamma, beta):
    """Pure-JAX reference mirroring the PyTorch forward (training-mode BN, biased var)."""
    x = x42 + x50
    y = lax.conv_general_dilated(
        x, weight, window_strides=(1, 1), padding="VALID",
        dimension_numbers=("NCHW", "OIHW", "NCHW"))
    mean = y.mean(axis=(0, 2, 3), keepdims=True)
    var = jnp.square(y - mean).mean(axis=(0, 2, 3), keepdims=True)
    y_hat = (y - mean) / jnp.sqrt(var + EPS)
    return y_hat * gamma.reshape(1, -1, 1, 1) + beta.reshape(1, -1, 1, 1)


if __name__ == "__main__":
    key = jax.random.PRNGKey(0)
    k1, k2, k3, k4, k5 = jax.random.split(key, 5)

    N, Cin, H, W = 1, 32, 28, 28
    Cout = 192

    x42 = jax.random.normal(k1, (N, Cin, H, W), dtype=jnp.float32)
    x50 = jax.random.normal(k2, (N, Cin, H, W), dtype=jnp.float32)

    # Deterministic parameter init (synthetic, not a checkpoint load).
    weight = jax.random.normal(k3, (Cout, Cin, 1, 1), dtype=jnp.float32) * 0.1
    gamma = 1.0 + 0.1 * jax.random.normal(k4, (Cout,), dtype=jnp.float32)
    beta = 0.1 * jax.random.normal(k5, (Cout,), dtype=jnp.float32)

    out = add_conv1x1_bn(x42, x50, weight, gamma, beta)
    out = jax.block_until_ready(out)

    ref = reference(x42, x50, weight, gamma, beta)
    assert out.shape == (N, Cout, H, W), out.shape
    assert jnp.allclose(out, ref, atol=1e-4, rtol=1e-4), float(jnp.max(jnp.abs(out - ref)))

    print("KERNEL_OK")
</pallas_src>

<mosaic_0001>
module attributes {stable_mosaic.version = 11 : i64} {
  func.func @add_conv1x1_bn_kernel(%arg0: memref<32x784xf32, #tpu.memory_space<vmem>>, %arg1: memref<32x784xf32, #tpu.memory_space<vmem>>, %arg2: memref<192x32xf32, #tpu.memory_space<vmem>>, %arg3: memref<192x1xf32, #tpu.memory_space<vmem>>, %arg4: memref<192x1xf32, #tpu.memory_space<vmem>>, %arg5: memref<192x784xf32, #tpu.memory_space<vmem>>) attributes {dimension_semantics = [], scalar_prefetch = 0 : i64, scratch_operands = 0 : i64, tpu.core_type = #tpu.core_type<tc>} {
    %c0 = arith.constant 0 : index
    %c0_0 = arith.constant 0 : index
    %0 = vector.load %arg0[%c0, %c0_0] : memref<32x784xf32, #tpu.memory_space<vmem>>, vector<32x784xf32>
    %c0_1 = arith.constant 0 : index
    %c0_2 = arith.constant 0 : index
    %1 = vector.load %arg1[%c0_1, %c0_2] : memref<32x784xf32, #tpu.memory_space<vmem>>, vector<32x784xf32>
    %2 = arith.addf %0, %1 : vector<32x784xf32>
    %c0_3 = arith.constant 0 : index
    %c0_4 = arith.constant 0 : index
    %3 = vector.load %arg2[%c0_3, %c0_4] : memref<192x32xf32, #tpu.memory_space<vmem>>, vector<192x32xf32>
    %cst = arith.constant dense<0.000000e+00> : vector<32xf32>
    %4 = vector.multi_reduction <add>, %2, %cst [1] : vector<32x784xf32> to vector<32xf32>
    %5 = vector.shape_cast %4 : vector<32xf32> to vector<32x1xf32>
    %cst_5 = arith.constant 0.00127551018 : f32
    %6 = vector.broadcast %cst_5 : f32 to vector<32x1xf32>
    %7 = arith.mulf %5, %6 : vector<32x1xf32>
    %8 = vector.broadcast %7 : vector<32x1xf32> to vector<32x784xf32>
    %9 = arith.subf %2, %8 : vector<32x784xf32>
    %cst_6 = arith.constant dense<0.000000e+00> : vector<32x32xf32>
    %10 = tpu.matmul %9, %9, %cst_6 {dimension_numbers = #tpu.dot_dimension_numbers<[1], [1], [0], [0], [0, 0, 1, 0], [], []>} : vector<32x784xf32>, vector<32x784xf32>, vector<32x32xf32> -> vector<32x32xf32>
    %cst_7 = arith.constant dense<0.000000e+00> : vector<192x32xf32>
    %11 = tpu.matmul %3, %10, %cst_7 {dimension_numbers = #tpu.dot_dimension_numbers<[1], [0], [0], [1], [0, 0, 1, 1], [], []>} : vector<192x32xf32>, vector<32x32xf32>, vector<192x32xf32> -> vector<192x32xf32>
    %12 = arith.mulf %11, %3 : vector<192x32xf32>
    %cst_8 = arith.constant dense<0.000000e+00> : vector<192xf32>
    %13 = vector.multi_reduction <add>, %12, %cst_8 [1] : vector<192x32xf32> to vector<192xf32>
    %14 = vector.shape_cast %13 : vector<192xf32> to vector<192x1xf32>
    %cst_9 = arith.constant 0.00127551018 : f32
    %15 = vector.broadcast %cst_9 : f32 to vector<192x1xf32>
    %16 = arith.mulf %14, %15 : vector<192x1xf32>
    %c0_10 = arith.constant 0 : index
    %c0_11 = arith.constant 0 : index
    %17 = vector.load %arg3[%c0_10, %c0_11] : memref<192x1xf32, #tpu.memory_space<vmem>>, vector<192x1xf32>
    %cst_12 = arith.constant 9.99999974E-6 : f32
    %18 = vector.broadcast %cst_12 : f32 to vector<192x1xf32>
    %19 = arith.addf %16, %18 : vector<192x1xf32>
    %20 = math.rsqrt %19 : vector<192x1xf32>
    %21 = arith.mulf %17, %20 : vector<192x1xf32>
    %c0_13 = arith.constant 0 : index
    %c0_14 = arith.constant 0 : index
    %22 = vector.load %arg4[%c0_13, %c0_14] : memref<192x1xf32, #tpu.memory_space<vmem>>, vector<192x1xf32>
    %23 = vector.broadcast %21 : vector<192x1xf32> to vector<192x32xf32>
    %24 = arith.mulf %3, %23 : vector<192x32xf32>
    %cst_15 = arith.constant dense<0.000000e+00> : vector<192x784xf32>
    %25 = tpu.matmul %24, %9, %cst_15 {dimension_numbers = #tpu.dot_dimension_numbers<[1], [0], [0], [1], [0, 0, 1, 1], [], []>} : vector<192x32xf32>, vector<32x784xf32>, vector<192x784xf32> -> vector<192x784xf32>
    %26 = vector.broadcast %22 : vector<192x1xf32> to vector<192x784xf32>
    %27 = arith.addf %25, %26 : vector<192x784xf32>
    %c0_16 = arith.constant 0 : index
    %c0_17 = arith.constant 0 : index
    %28 = vector.load %arg5[%c0_16, %c0_17] : memref<192x784xf32, #tpu.memory_space<vmem>>, vector<192x784xf32>
    tpu.vector_store %arg5[%c0_16, %c0_17], %27 {strides = array<i32>} : memref<192x784xf32, #tpu.memory_space<vmem>>, vector<192x784xf32>,
    return
  }
}

</mosaic_0001>

<bundles_post_ra>
// kernel: tpu_custom_call.1
= control target key start
LH: loop header
LB: loop body
LE: loop exit
PB: predicated region body
PF: predicated region fallthrough
CT: control target
= control target key end

     0   :  { %vm134_vm0 = vcmask 130048   ;;  %s4200_s0 = inlined_call_operand.vmem [shape: f32[32,784], index: 0, kind: input, shape index: {}]   ;;  %s4201_s1 = inlined_call_operand.vmem [shape: f32[32,784], index: 1, kind: input, shape index: {}]   ;;  %s4202_s2 = inlined_call_operand.vmem [shape: f32[192,32], index: 2, kind: input, shape index: {}]   ;;  %s4203_s3 = inlined_call_operand.vmem [shape: f32[192,1], index: 3, kind: input, shape index: {}]   ;;  %s4204_s4 = inlined_call_operand.vmem [shape: f32[192,1], index: 4, kind: input, shape index: {}]   ;;  %s4205_s5 = inlined_call_operand.hbm [shape: f32[192,784], index: 5, kind: output, shape index: {}]  }
   0x1   :  { %v21_v0 = vld [vmem:[%s4200_s0] sm:$0xff]  ;;  %v22_v1 = vld [vmem:[%s4200_s0 + $0x8] sm:$0xff]  ;;  %v23_v2 = vld [vmem:[%s4200_s0 + $0x10] sm:$0xff] }
   0x2   :  { %v24_v3 = vld [vmem:[%s4200_s0 + $0x18] sm:$0xff]  ;;  %v49_v4 = vld [vmem:[%s4201_s1] sm:$0xff]  ;;  %v50_v5 = vld [vmem:[%s4201_s1 + $0x8] sm:$0xff] }
   0x3   :  { %v25_v6 = vld [vmem:[%s4200_s0 + $0x20] sm:$0xff]  ;;  %v51_v7 = vld [vmem:[%s4201_s1 + $0x10] sm:$0xff]  ;;  %v52_v8 = vld [vmem:[%s4201_s1 + $0x18] sm:$0xff]  ;;  %v2911_v9 = vadd.f32 %v49_v4, %v21_v0  ;;  %v2913_v10 = vadd.f32 %v50_v5, %v22_v1 }
   0x4   :  { %v27_v11 = vld [vmem:[%s4200_s0 + $0x30] sm:$0xff]  ;;  %v53_v12 = vld [vmem:[%s4201_s1 + $0x20] sm:$0xff]  ;;  %v2924_v14 = vadd.f32 %v51_v7, %v23_v2  ;;  %v2926_v15 = vadd.f32 %v52_v8, %v24_v3  ;;  %v36_v18 = vld [vmem:[%s4200_s0 + $0x78] sm:$0xff] }
   0x5   :  { %v55_v13 = vld [vmem:[%s4201_s1 + $0x30] sm:$0xff]  ;;  %v129_v16 = vadd.f32 %v2913_v10, %v2911_v9  ;;  %v37_v19 = vld [vmem:[%s4200_s0 + $0x80] sm:$0xff]  ;;  %v26_v20 = vld [vmem:[%s4200_s0 + $0x28] sm:$0xff]  ;;  %v2948_v23 = vadd.f32 %v53_v12, %v25_v6 }
   0x6   :  { %v35_v17 = vld [vmem:[%s4200_s0 + $0x70] sm:$0xff]  ;;  %v54_v21 = vld [vmem:[%s4201_s1 + $0x28] sm:$0xff]  ;;  %v2950_v24 = vadd.f32 %v55_v13, %v27_v11  ;;  %v64_v27 = vld [vmem:[%s4201_s1 + $0x78] sm:$0xff] }
   0x7   :  { %v38_v22 = vld [vmem:[%s4200_s0 + $0x88] sm:$0xff]  ;;  %v130_v25 = vadd.f32 %v129_v16, %v2924_v14  ;;  %v63_v26 = vld [vmem:[%s4201_s1 + $0x70] sm:$0xff]  ;;  %v65_v28 = vld [vmem:[%s4201_s1 + $0x80] sm:$0xff]  ;;  %v2973_v33 = vadd.f32 %v64_v27, %v36_v18  ;;  %v2977_v35 = vadd.f32 %v54_v21, %v26_v20 }
   0x8   :  { %v39_v29 = vld [vmem:[%s4200_s0 + $0x90] sm:$0xff]  ;;  %v41_v30 = vld [vmem:[%s4200_s0 + $0xa0] sm:$0xff]  ;;  %v66_v31 = vld [vmem:[%s4201_s1 + $0x88] sm:$0xff]  ;;  %v2971_v32 = vadd.f32 %v63_v26, %v35_v17  ;;  %v2975_v34 = vadd.f32 %v65_v28, %v37_v19  ;;  %v135_v46 = vsel %vm134_vm0, %v2950_v24, 0.0 }
   0x9   :  { %v131_v36 = vadd.f32 %v130_v25, %v2926_v15  ;;  %v67_v37 = vld [vmem:[%s4201_s1 + $0x90] sm:$0xff]  ;;  %v69_v38 = vld [vmem:[%s4201_s1 + $0xa0] sm:$0xff]  ;;  %v28_v39 = vld [vmem:[%s4200_s0 + $0x38] sm:$0xff]  ;;  %v2992_v41 = vadd.f32 %v66_v31, %v38_v22 }
   0xa   :  { %v40_v40 = vld [vmem:[%s4200_s0 + $0x98] sm:$0xff]  ;;  %v148_v42 = vadd.f32 %v2973_v33, %v2971_v32  ;;  %v29_v43 = vld [vmem:[%s4200_s0 + $0x40] sm:$0xff]  ;;  %v30_v44 = vld [vmem:[%s4200_s0 + $0x48] sm:$0xff]  ;;  %v3014_v50 = vadd.f32 %v67_v37, %v39_v29  ;;  %v3016_v51 = vadd.f32 %v69_v38, %v41_v30 }
   0xb   :  { %v132_v45 = vadd.f32 %v131_v36, %v2948_v23  ;;  %v68_v47 = vld [vmem:[%s4201_s1 + $0x98] sm:$0xff]  ;;  %v31_v48 = vld [vmem:[%s4200_s0 + $0x50] sm:$0xff]  ;;  %v57_v53 = vld [vmem:[%s4201_s1 + $0x40] sm:$0xff] }
   0xc   :  { %v56_v49 = vld [vmem:[%s4201_s1 + $0x38] sm:$0xff]  ;;  %v149_v52 = vadd.f32 %v148_v42, %v2975_v34  ;;  %v58_v54 = vld [vmem:[%s4201_s1 + $0x48] sm:$0xff]  ;;  %v59_v55 = vld [vmem:[%s4201_s1 + $0x50] sm:$0xff]  ;;  %v3037_v60 = vadd.f32 %v57_v53, %v29_v43  ;;  %v3041_v62 = vadd.f32 %v68_v47, %v40_v40  ;;  %v153_v13 = vsel %vm134_vm0, %v3016_v51, 0.0 }
   0xd   :  { %v3028_v56 = vadd.f32 %v56_v49, %v28_v39  ;;  %v133_v57 = vadd.f32 %v132_v45, %v2977_v35  ;;  %v32_v58 = vld [vmem:[%s4200_s0 + $0x58] sm:$0xff]  ;;  %v34_v59 = vld [vmem:[%s4200_s0 + $0x68] sm:$0xff]  ;;  %v3039_v61 = vadd.f32 %v58_v54, %v30_v44  ;;  %v33_v0 = vld [vmem:[%s4200_s0 + $0x60] sm:$0xff]  ;;  %v3062_v7 = vadd.f32 %v59_v55, %v31_v48 }
   0xe   :  { %v150_v63 = vadd.f32 %v149_v52, %v2992_v41  ;;  %v60_v1 = vld [vmem:[%s4201_s1 + $0x58] sm:$0xff]  ;;  %v42_v2 = vld [vmem:[%s4200_s0 + $0xa8] sm:$0xff]  ;;  %v43_v3 = vld [vmem:[%s4200_s0 + $0xb0] sm:$0xff] }
   0xf   :  { %v136_v4 = vadd.f32 %v135_v46, %v133_v57  ;;  %v61_v5 = vld [vmem:[%s4201_s1 + $0x60] sm:$0xff]  ;;  %v62_v6 = vld [vmem:[%s4201_s1 + $0x68] sm:$0xff]  ;;  %v139_v8 = vadd.f32 %v3037_v60, %v3028_v56  ;;  %v44_v11 = vld [vmem:[%s4200_s0 + $0xb8] sm:$0xff]  ;;  %v3081_v19 = vadd.f32 %v60_v1, %v32_v58 }
  0x10   :  { %v151_v12 = vadd.f32 %v150_v63, %v3014_v50  ;;  %v45_v16 = vld [vmem:[%s4200_s0 + $0xc0] sm:$0xff]  ;;  %v70_v17 = vld [vmem:[%s4201_s1 + $0xa8] sm:$0xff]  ;;  %v71_v18 = vld [vmem:[%s4201_s1 + $0xb0] sm:$0xff]  ;;  %v90_v28 = vadd.f32 %v62_v6, %v34_v59 }
  0x11   :  { %137 = vadd.xlane.f32.xlu0 %v136_v4  ;;  %v140_v20 = vadd.f32 %v139_v8, %v3039_v61  ;;  %v72_v21 = vld [vmem:[%s4201_s1 + $0xb8] sm:$0xff]  ;;  %v73_v22 = vld [vmem:[%s4201_s1 + $0xc0] sm:$0xff]  ;;  %v3090_v25 = vadd.f32 %v70_v17, %v42_v2  ;;  %v99_v26 = vadd.f32 %v71_v18, %v43_v3  ;;  %v46_v29 = vld [vmem:[%s4200_s0 + $0xc8] sm:$0xff] }
  0x12   :  { %v152_v27 = vadd.f32 %v151_v12, %v3041_v62  ;;  %v74_v30 = vld [vmem:[%s4201_s1 + $0xc8] sm:$0xff]  ;;  %v3099_v31 = vadd.f32 %v72_v21, %v44_v11 }
  0x13   :  { %10 = vsyncpa [#allocation3], 0  ;;  %v3101_v36 = vadd.f32 %v61_v5, %v33_v0  ;;  %v141_v37 = vadd.f32 %v140_v20, %v3062_v7  ;;  %v48_v38 = vld [vmem:[%s4200_s0 + $0xd8] sm:$0xff]  ;;  %v3110_v40 = vadd.f32 %v73_v22, %v45_v16  ;;  %v157_v42 = vadd.f32 %v99_v26, %v3090_v25  ;;  %v47_v44 = vld [vmem:[%s4200_s0 + $0xd0] sm:$0xff] }
  0x14   :  { %v76_v39 = vld [vmem:[%s4201_s1 + $0xd8] sm:$0xff]  ;;  %v154_v43 = vadd.f32 %v153_v13, %v152_v27  ;;  %v75_v45 = vld [vmem:[%s4201_s1 + $0xd0] sm:$0xff]  ;;  %v3120_v47 = vadd.f32 %v74_v30, %v46_v29  ;;  %v144_v49 = vsel %vm134_vm0, %v90_v28, 0.0  ;;  %vm3146_vm1 = vmpackc.low %vm134_vm0, %vm134_vm0  ;;  %vm550_vm2 = vcmask 261120  }
  0x15   :  { %v142_v46 = vadd.f32 %v141_v37, %v3081_v19  ;;  %v158_v48 = vadd.f32 %v157_v42, %v3099_v31  ;;  %v104_v52 = vadd.f32 %v76_v39, %v48_v38  ;;  %v3125_v54 = vadd.f32 %v75_v45, %v47_v44 }
  0x16   :  { %155 = vadd.xlane.f32.xlu1 %v154_v43 }
  0x17   :  { %v143_v53 = vadd.f32 %v142_v46, %v3101_v36  ;;  %v159_v55 = vadd.f32 %v158_v48, %v3110_v40  ;;  %v162_v59 = vsel %vm134_vm0, %v104_v52, 0.0 }
  0x19   :  { %v145_v57 = vadd.f32 %v144_v49, %v143_v53  ;;  %v160_v58 = vadd.f32 %v159_v55, %v3120_v47 }
  0x1b   :  { %146 = vadd.xlane.f32.xlu0 %v145_v57  ;;  %v161_v63 = vadd.f32 %v160_v58, %v3125_v54 }
  0x1d   :  { %v163_v0 = vadd.f32 %v162_v59, %v161_v63 }
  0x1f   :  { %164 = vadd.xlane.f32.xlu1 %v163_v0 }
  0x9e   :  { %v138_v1 = vpop.xlane.xlu0 %137 }
  0x9f   :  { %v3131_v2 = vmul.f32 0.0012755102, %v138_v1 }
  0xa1   :  { %v171_v3 = vsub.f32 %v2913_v10, %v3131_v2  ;;  %v176_v4 = vsub.f32 %v2950_v24, %v3131_v2  ;;  %v170_v16 = vsub.f32 %v2911_v9, %v3131_v2  ;;  %v173_v30 = vsub.f32 %v2926_v15, %v3131_v2  ;;  %v3299_v24 = vld [vmem:[%s4202_s2 + $0x40] sm:$0xff] }
  0xa2   :  { %v172_v15 = vsub.f32 %v2924_v14, %v3131_v2 }
  0xa3   :  { %274 = vmatprep.mubr.f32.mxu0 %v171_v3  ;;  %2580 = vmatprep.mubr.msk.f32.mxu1 %vm134_vm0, %v176_v4  ;;  %v156_v5 = vpop.xlane.xlu1 %155 }
  0xa4   :  { %v3138_v6 = vmul.f32 0.0012755102, %v156_v5 }
  0xa6   :  { %v185_v18 = vsub.f32 %v2973_v33, %v3138_v6  ;;  %v190_v20 = vsub.f32 %v3016_v51, %v3138_v6 }
  0xa8   :  { %v147_v8 = vpop.xlane.xlu0 %146 }
  0xa9   :  { %v167_v11 = vmul.f32 0.0012755102, %v147_v8  ;;  %v3247_v8 = vld [vmem:[%s4202_s2 + $0x8] sm:$0xff] }
  0xab   :  { %v178_v12 = vsub.f32 %v3037_v60, %v167_v11  ;;  %v183_v13 = vsub.f32 %v90_v28, %v167_v11  ;;  %v177_v17 = vsub.f32 %v3028_v56, %v167_v11  ;;  %v184_v28 = vsub.f32 %v2971_v32, %v3138_v6 }
  0xac   :  { %v165_v10 = vpop.xlane.xlu1 %164  ;;  %v179_v32 = vsub.f32 %v3039_v61, %v167_v11  ;;  %v182_v14 = vsub.f32 %v3101_v36, %v167_v11 }
  0xad   :  { %v3154_v60 = vpack.c.bf16 %v178_v12, %v171_v3  ;;  %v3156_v21 = vpack.c.bf16 %v183_v13, %v176_v4  ;;  %v169_v9 = vmul.f32 0.0012755102, %v165_v10  ;;  %v3158_v22 = vpack.c.bf16 %v177_v17, %v170_v16  ;;  %v3294_v10 = vld [vmem:[%s4202_s2 + $0x38] sm:$0xff] }
  0xae   :  { %v3197_v39 = vpack.c.bf16 %v179_v32, %v172_v15 }
  0xaf   :  { %2675 = vmatprep.subr.bf16.mxu0 %v3154_v60  ;;  %2700 = vmatprep.subr.msk.bf16.mxu1 %vm3146_vm1, %v3156_v21  ;;  %v192_v56 = vsub.f32 %v99_v26, %v169_v9  ;;  %v197_v27 = vsub.f32 %v104_v52, %v169_v9  ;;  %v191_v29 = vsub.f32 %v3090_v25, %v169_v9 }
  0xb0   :  { %2677 = vmatpush1.bf16.xpose.msra.mxu0 %v3158_v22  ;;  %2703 = vmatpush3.bf16.xpose.msk.msra.mxu1 %vm3146_vm1, %v3156_v21  ;;  %v180_v26 = vsub.f32 %v3062_v7, %v167_v11  ;;  %v187_v7 = vsub.f32 %v2992_v41, %v3138_v6  ;;  %v194_v25 = vsub.f32 %v3110_v40, %v169_v9 }
  0xb1   :  { %v3168_v33 = vpack.c.bf16 %v192_v56, %v185_v18  ;;  %v3170_v51 = vpack.c.bf16 %v197_v27, %v190_v20  ;;  %v3182_v37 = vpack.c.bf16 %v191_v29, %v184_v28  ;;  %v186_v41 = vsub.f32 %v2975_v34, %v3138_v6 }
  0xb2   :  { %v3184_v38 = vpack.c.bf16 %v180_v26, %v173_v30  ;;  %v3200_v42 = vpack.c.bf16 %v194_v25, %v187_v7  ;;  %v193_v61 = vsub.f32 %v3099_v31, %v169_v9  ;;  %v175_v40 = vsub.f32 %v2977_v35, %v3131_v2 }
  0xb3   :  { %2679 = vmatprep.subr.bf16.mxu0 %v3168_v33  ;;  %2706 = vmatprep.subr.msk.bf16.mxu1 %vm3146_vm1, %v3170_v51  ;;  %v181_v34 = vsub.f32 %v3081_v19, %v167_v11  ;;  %v189_v31 = vsub.f32 %v3041_v62, %v3138_v6  ;;  %v196_v36 = vsub.f32 %v3125_v54, %v169_v9  ;;  %v3253_v11 = vld [vmem:[%s4202_s2 + $0x10] sm:$0xff] }
  0xb4   :  { %v3212_v43 = vpack.c.bf16 %v193_v61, %v186_v41  ;;  %v2690_v44 = vpack.c.bf16 %v182_v14, %v175_v40  ;;  %v174_v35 = vsub.f32 %v2948_v23, %v3131_v2  ;;  %v188_v19 = vsub.f32 %v3014_v50, %v3138_v6  ;;  %v3240_v23 = vld [vmem:[%s4202_s2] sm:$0xff] }
  0xb5   :  { %v3223_v46 = vpack.c.bf16 %v196_v36, %v189_v31  ;;  %v195_v62 = vsub.f32 %v3120_v47, %v169_v9  ;;  %v3327_v9 = vld [vmem:[%s4202_s2 + $0x60] sm:$0xff] }
  0xb6   :  { %v3221_v45 = vpack.c.bf16 %v181_v34, %v174_v35 }
  0xb7   :  { %v3230_v48 = vpack.c.bf16 %v195_v62, %v188_v19 }
  0xb8   :  { %2681 = vmatpush1.bf16.xpose.msra.mxu0 %v3182_v37  ;;  %2709 = vmatpush3.bf16.xpose.msk.msra.mxu1 %vm3146_vm1, %v3170_v51 }
  0xb9   :  { %2683 = vmatprep.subr.bf16.mxu0 %v3184_v38 }
  0xbf   :  { %275 = vmatmul.mubr.f32.vlgmr.msra.gmra.mrb[0].mxu0 %v170_v16  ;;  %2581 = vmatmul.mubr.msk.f32.vlgmr.msra.gmra.mrb[0].mxu1 %vm134_vm0, %v183_v13  ;;  %v3269_v13 = vld [vmem:[%s4202_s2 + $0x20] sm:$0xff]  ;;  %v3279_v16 = vld [vmem:[%s4202_s2 + $0x28] sm:$0xff] }
  0xc0   :  { %279 = vmatprep.mubr.f32.mxu0 %v178_v12  ;;  %2685 = vmatpush1.bf16.xpose.msra.mxu0 %v3197_v39  ;;  %v3263_v12 = vld [vmem:[%s4202_s2 + $0x18] sm:$0xff] }
  0xc1   :  { %2583 = vmatprep.mubr.msk.f32.mxu1 %vm134_vm0, %v190_v20  ;;  %2687 = vmatprep.subr.bf16.mxu0 %v3200_v42  ;;  %v3313_v20 = vld [vmem:[%s4202_s2 + $0x50] sm:$0xff] }
  0xc3   :  { %280 = vmatmul.mubr.f32.gmra.mrb[2].mxu0 %v177_v17  ;;  %2584 = vmatmul.mubr.msk.f32.gmra.mrb[2].mxu1 %vm134_vm0, %v197_v27  ;;  %v3285_v17 = vld [vmem:[%s4202_s2 + $0x30] sm:$0xff]  ;;  %v3350_v27 = vld [vmem:[%s4202_s2 + $0x78] sm:$0xff] }
  0xc4   :  { %284 = vmatprep.mubr.f32.mxu0 %v185_v18  ;;  %2594 = vmatprep.mubr.msk.f32.mxu1 %vm550_vm2, %v3240_v23  ;;  %v3308_v18 = vld [vmem:[%s4202_s2 + $0x48] sm:$0xff] }
  0xc7   :  { %285 = vmatmul.mubr.f32.gmra.mrb[4].mxu0 %v184_v28  ;;  %v3364_v28 = vld [vmem:[%s4202_s2 + $0x88] sm:$0xff] }
  0xc8   :  { %289 = vmatprep.mubr.f32.mxu0 %v192_v56  ;;  %2689 = vmatpush1.bf16.xpose.msra.mxu0 %v3212_v43  ;;  %v3341_v56 = vld [vmem:[%s4202_s2 + $0x70] sm:$0xff] }
  0xc9   :  { %2691 = vmatprep.subr.bf16.mxu0 %v2690_v44 }
  0xcb   :  { %290 = vmatmul.mubr.f32.gmra.mrb[6].mxu0 %v191_v29  ;;  %v3369_v29 = vld [vmem:[%s4202_s2 + $0x90] sm:$0xff] }
  0xcc   :  { %359 = vmatprep.mubr.f32.mxu0 %v173_v30  ;;  %v3383_v30 = vld [vmem:[%s4202_s2 + $0xa0] sm:$0xff] }
  0xcf   :  { %360 = vmatmul.mubr.f32.vlgmr.msra.gmra.mrb[0].mxu0 %v172_v15 }
  0xd0   :  { %364 = vmatprep.mubr.f32.mxu0 %v180_v26  ;;  %2693 = vmatpush1.bf16.xpose.msra.mxu0 %v3221_v45  ;;  %v3378_v26 = vld [vmem:[%s4202_s2 + $0x98] sm:$0xff] }
  0xd1   :  { %2695 = vmatprep.subr.bf16.mxu0 %v3223_v46 }
  0xd3   :  { %365 = vmatmul.mubr.f32.gmra.mrb[2].mxu0 %v179_v32  ;;  %v3406_v32 = vld [vmem:[%s4202_s2 + $0xb8] sm:$0xff] }
  0xd4   :  { %369 = vmatprep.mubr.f32.mxu0 %v187_v7 }
  0xd7   :  { %370 = vmatmul.mubr.f32.gmra.mrb[4].mxu0 %v186_v41 }
  0xd8   :  { %374 = vmatprep.mubr.f32.mxu0 %v194_v25  ;;  %2697 = vmatpush1.bf16.xpose.msra.mxu0 %v3230_v48 }
  0xd9   :  { %2719 = vmatprep.subr.bf16.mxu0 %v3154_v60 }
  0xdb   :  { %375 = vmatmul.mubr.f32.gmra.mrb[6].mxu0 %v193_v61 }
  0xdc   :  { %444 = vmatprep.mubr.f32.mxu0 %v175_v40 }
  0xdf   :  { %445 = vmatmul.mubr.f32.vlgmr.msra.gmra.mrb[0].mxu0 %v174_v35 }
  0xe0   :  { %449 = vmatprep.mubr.f32.mxu0 %v182_v14  ;;  %2721 = vmatpush1.bf16.msra.mxu0 %v3158_v22 }
  0xe1   :  { %2723 = vmatprep.subr.bf16.mxu0 %v3168_v33 }
  0xe3   :  { %450 = vmatmul.mubr.f32.gmra.mrb[2].mxu0 %v181_v34 }
  0xe4   :  { %454 = vmatprep.mubr.f32.mxu0 %v189_v31  ;;  %2725 = vmatpush1.bf16.msra.mxu0 %v3182_v37 }
  0xe5   :  { %2735 = vmatprep.subr.bf16.mxu0 %v2690_v44 }
  0xe7   :  { %455 = vmatmul.mubr.f32.gmra.mrb[4].mxu0 %v188_v19 }
  0xe8   :  { %459 = vmatprep.mubr.f32.mxu0 %v196_v36 }
  0xeb   :  { %460 = vmatmul.mubr.f32.gmra.mrb[6].mxu0 %v195_v62 }
 0x192   :  { %v2582_v50 = vpop.f32.mrb[0].mxu1 }
 0x193   :  { %v531_v47 = vpop.f32.mrb[1].mxu1 }
 0x196   :  { %v2585_v49 = vpop.f32.mrb[2].mxu1 }
 0x197   :  { %v541_v52 = vpop.f32.mrb[3].mxu1 }
 0x1b2   :  { %v446_v53 = vpop.f32.mrb[0].mxu0 }
 0x1b3   :  { %v532_v54 = vadd.f32 %v531_v47, %v446_v53  ;;  %v448_v55 = vpop.f32.mrb[1].mxu0 }
 0x1b6   :  { %v451_v57 = vpop.f32.mrb[2].mxu0 }
 0x1b7   :  { %v537_v58 = vadd.f32 %v2582_v50, %v451_v57  ;;  %v453_v59 = vpop.f32.mrb[3].mxu0 }
 0x1b9   :  { %v2710_v63 = vpack.c.bf16 %v537_v58, %v532_v54 }
 0x1ba   :  { %v456_v0 = vpop.f32.mrb[4].mxu0 }
 0x1bb   :  { %v542_v1 = vadd.f32 %v541_v52, %v456_v0  ;;  %v458_v2 = vpop.f32.mrb[5].mxu0  ;;  %2711 = vmatprep.subr.bf16.mxu1 %v2710_v63 }
 0x1bc   :  { %2713 = vmatpush3.bf16.msra.mxu1 %v2710_v63 }
 0x1be   :  { %v461_v3 = vpop.f32.mrb[6].mxu0 }
 0x1bf   :  { %v547_v4 = vadd.f32 %v2585_v49, %v461_v3  ;;  %v463_v5 = vpop.f32.mrb[7].mxu0 }
 0x1c1   :  { %v2714_v6 = vpack.c.bf16 %v547_v4, %v542_v1 }
 0x1c3   :  { %2715 = vmatprep.subr.bf16.mxu1 %v2714_v6 }
 0x1c4   :  { %2717 = vmatpush3.bf16.msra.mxu1 %v2714_v6 }
 0x1c5   :  { %2750 = vmatprep.subr.bf16.mxu1 %v3154_v60  ;;  %v3322_v60 = vld [vmem:[%s4202_s2 + $0x58] sm:$0xff] }
 0x1c7   :  { %2595 = vmatmul.mubr.msk.f32.vlgmr.msra.gmra.mrb[4].mxu1 %vm550_vm2, %v3247_v8 }
 0x1c8   :  { %2752 = vmatpush1.bf16.msra.mxu1 %v3158_v22  ;;  %2597 = vmatprep.mubr.msk.f32.mxu1 %vm550_vm2, %v3253_v11  ;;  %v3336_v22 = vld [vmem:[%s4202_s2 + $0x68] sm:$0xff] }
 0x1c9   :  { %2751 = vmatprep.subr.bf16.mxu1 %v3168_v33  ;;  %v3355_v33 = vld [vmem:[%s4202_s2 + $0x80] sm:$0xff] }
 0x1cb   :  { %2598 = vmatmul.mubr.msk.f32.gmra.mrb[6].mxu1 %vm550_vm2, %v3263_v12 }
 0x1cc   :  { %2753 = vmatpush1.bf16.msra.mxu1 %v3182_v37  ;;  %2600 = vmatprep.mubr.msk.f32.mxu1 %vm550_vm2, %v3269_v13  ;;  %v3392_v37 = vld [vmem:[%s4202_s2 + $0xa8] sm:$0xff] }
 0x1cd   :  { %2727 = vmatprep.subr.bf16.mxu1 %v3184_v38  ;;  %v3397_v38 = vld [vmem:[%s4202_s2 + $0xb0] sm:$0xff] }
 0x1cf   :  { %2601 = vmatmul.mubr.msk.f32.gmra.mrb[8].mxu1 %vm550_vm2, %v3279_v16 }
 0x1d0   :  { %2603 = vmatprep.mubr.msk.f32.mxu1 %vm550_vm2, %v3285_v17 }
 0x1d3   :  { %2604 = vmatmul.mubr.msk.f32.gmra.mrb[10].mxu1 %vm550_vm2, %v3294_v10 }
 0x1d4   :  { %2606 = vmatprep.mubr.msk.f32.mxu1 %vm550_vm2, %v3299_v24 }
 0x1d7   :  { %2607 = vmatmul.mubr.msk.f32.gmra.mrb[12].mxu1 %vm550_vm2, %v3308_v18 }
 0x1d8   :  { %2609 = vmatprep.mubr.msk.f32.mxu1 %vm550_vm2, %v3313_v20 }
 0x1db   :  { %2610 = vmatmul.mubr.msk.f32.gmra.mrb[14].mxu1 %vm550_vm2, %v3322_v60 }
 0x1dc   :  { %2612 = vmatprep.mubr.msk.f32.mxu1 %vm550_vm2, %v3327_v9 }
 0x1df   :  { %2613 = vmatmul.mubr.msk.f32.gmra.mrb[16].mxu1 %vm550_vm2, %v3336_v22 }
 0x1e0   :  { %2615 = vmatprep.mubr.msk.f32.mxu1 %vm550_vm2, %v3341_v56 }
 0x1e3   :  { %2616 = vmatmul.mubr.msk.f32.gmra.mrb[18].mxu1 %vm550_vm2, %v3350_v27 }
 0x1e4   :  { %2618 = vmatprep.mubr.msk.f32.mxu1 %vm550_vm2, %v3355_v33 }
 0x1e7   :  { %2619 = vmatmul.mubr.msk.f32.gmra.mrb[20].mxu1 %vm550_vm2, %v3364_v28 }
 0x1e8   :  { %2621 = vmatprep.mubr.msk.f32.mxu1 %vm550_vm2, %v3369_v29 }
 0x1eb   :  { %2622 = vmatmul.mubr.msk.f32.gmra.mrb[22].mxu1 %vm550_vm2, %v3378_v26 }
 0x1ec   :  { %2624 = vmatprep.mubr.msk.f32.mxu1 %vm550_vm2, %v3383_v30 }
 0x1ef   :  { %2625 = vmatmul.mubr.msk.f32.gmra.mrb[24].mxu1 %vm550_vm2, %v3392_v37 }
 0x1f0   :  { %2627 = vmatprep.mubr.msk.f32.mxu1 %vm550_vm2, %v3397_v38 }
 0x1f3   :  { %2628 = vmatmul.mubr.msk.f32.gmra.mrb[26].mxu1 %vm550_vm2, %v3406_v32 }
 0x29a   :  { %v2596_v7 = vpop.f32.mrb[4].mxu1 }
 0x29b   :  { %v809_v25 = vmul.f32 %v2596_v7, %v3247_v8  ;;  %v689_v15 = vpop.f32.mrb[5].mxu1 }
 0x29c   :  { %v808_v41 = vmul.f32 %v689_v15, %v3240_v23 }
 0x29d   :  { %v835_v61 = vsel %vm550_vm2, %v809_v25, 0.0 }
 0x29e   :  { %v2599_v14 = vpop.f32.mrb[6].mxu1  ;;  %836 = vadd.xlane.f32.xlu1 %v835_v61  ;;  %v832_v40 = vsel %vm550_vm2, %v808_v41, 0.0 }
 0x29f   :  { %833 = vadd.xlane.f32.xlu0 %v832_v40  ;;  %v699_v44 = vpop.f32.mrb[7].mxu1  ;;  %v811_v31 = vmul.f32 %v2599_v14, %v3263_v12 }
 0x2a0   :  { %v810_v34 = vmul.f32 %v699_v44, %v3253_v11 }
 0x2a1   :  { %v841_v47 = vsel %vm550_vm2, %v811_v31, 0.0 }
 0x2a2   :  { %v2602_v36 = vpop.f32.mrb[8].mxu1  ;;  %v838_v35 = vsel %vm550_vm2, %v810_v34, 0.0  ;;  %v2849_v34 = vmov 0  }
 0x2a3   :  { %839 = vadd.xlane.f32.xlu0 %v838_v35  ;;  %v709_v19 = vpop.f32.mrb[9].mxu1  ;;  %v813_v52 = vmul.f32 %v2602_v36, %v3279_v16  ;;  %2776 = vset.pattern.permute.xlu1 %v2849_v34 }
 0x2a4   :  { %v812_v62 = vmul.f32 %v709_v19, %v3269_v13  ;;  %2775 = vset.pattern.permute.xlu0 %v2849_v34 }
 0x2a5   :  { %v847_v59 = vsel %vm550_vm2, %v813_v52, 0.0 }
 0x2a6   :  { %v2605_v50 = vpop.f32.mrb[10].mxu1  ;;  %v844_v54 = vsel %vm550_vm2, %v812_v62, 0.0 }
 0x2a7   :  { %842 = vadd.xlane.f32.xlu0 %v841_v47  ;;  %v719_v49 = vpop.f32.mrb[11].mxu1  ;;  %v815_v0 = vmul.f32 %v2605_v50, %v3294_v10 }
 0x2a8   :  { %v814_v57 = vmul.f32 %v719_v49, %v3285_v17 }
 0x2a9   :  { %v853_v6 = vsel %vm550_vm2, %v815_v0, 0.0 }
 0x2aa   :  { %v2608_v53 = vpop.f32.mrb[12].mxu1  ;;  %v850_v2 = vsel %vm550_vm2, %v814_v57, 0.0 }
 0x2ab   :  { %845 = vadd.xlane.f32.xlu0 %v844_v54  ;;  %v729_v55 = vpop.f32.mrb[13].mxu1  ;;  %v817_v4 = vmul.f32 %v2608_v53, %v3308_v18 }
 0x2ad   :  { %v859_v41 = vsel %vm550_vm2, %v817_v4, 0.0 }
 0x2ae   :  { %v2611_v58 = vpop.f32.mrb[14].mxu1 }
 0x2af   :  { %848 = vadd.xlane.f32.xlu0 %v847_v59  ;;  %v739_v63 = vpop.f32.mrb[15].mxu1  ;;  %v819_v25 = vmul.f32 %v2611_v58, %v3322_v60 }
 0x2b1   :  { %v865_v44 = vsel %vm550_vm2, %v819_v25, 0.0 }
 0x2b2   :  { %v2614_v1 = vpop.f32.mrb[16].mxu1 }
 0x2b3   :  { %851 = vadd.xlane.f32.xlu0 %v850_v2  ;;  %v749_v3 = vpop.f32.mrb[17].mxu1  ;;  %v821_v14 = vmul.f32 %v2614_v1, %v3336_v22 }
 0x2b5   :  { %v871_v50 = vsel %vm550_vm2, %v821_v14, 0.0  ;;  %v820_v14 = vmul.f32 %v749_v3, %v3327_v9 }
 0x2b6   :  { %v2617_v5 = vpop.f32.mrb[18].mxu1 }
 0x2b7   :  { %854 = vadd.xlane.f32.xlu0 %v853_v6  ;;  %v759_v7 = vpop.f32.mrb[19].mxu1  ;;  %v823_v19 = vmul.f32 %v2617_v5, %v3350_v27  ;;  %v816_v6 = vmul.f32 %v729_v55, %v3299_v24  ;;  %v868_v34 = vsel %vm550_vm2, %v820_v14, 0.0 }
 0x2b9   :  { %v877_v54 = vsel %vm550_vm2, %v823_v19, 0.0 }
 0x2ba   :  { %v2620_v15 = vpop.f32.mrb[20].mxu1 }
 0x2bb   :  { %860 = vadd.xlane.f32.xlu0 %v859_v41  ;;  %v769_v61 = vpop.f32.mrb[21].mxu1  ;;  %v825_v52 = vmul.f32 %v2620_v15, %v3364_v28  ;;  %v818_v15 = vmul.f32 %v739_v63, %v3313_v20  ;;  %v856_v41 = vsel %vm550_vm2, %v816_v6, 0.0 }
 0x2bc   :  { %v824_v55 = vmul.f32 %v769_v61, %v3355_v33 }
 0x2bd   :  { %v883_v1 = vsel %vm550_vm2, %v825_v52, 0.0 }
 0x2be   :  { %v2623_v40 = vpop.f32.mrb[22].mxu1 }
 0x2bf   :  { %v827_v31 = vmul.f32 %v2623_v40, %v3378_v26  ;;  %866 = vadd.xlane.f32.xlu0 %v865_v44  ;;  %v779_v36 = vpop.f32.mrb[23].mxu1  ;;  %v862_v40 = vsel %vm550_vm2, %v818_v15, 0.0  ;;  %v822_v44 = vmul.f32 %v759_v7, %v3341_v56  ;;  %v2850_v15 = vmov 0.0  }
 0x2c0   :  { %v826_v63 = vmul.f32 %v779_v36, %v3369_v29  ;;  %1448 = vmatprep.mubr.f32.mxu0 %v2850_v15  ;;  %1562 = vmatprep.mubr.f32.mxu1 %v2850_v15 }
 0x2c1   :  { %v889_v35 = vsel %vm550_vm2, %v827_v31, 0.0  ;;  %v874_v31 = vsel %vm550_vm2, %v822_v44, 0.0 }
 0x2c2   :  { %890 = vadd.xlane.f32.xlu1 %v889_v35  ;;  %v2626_v62 = vpop.f32.mrb[24].mxu1  ;;  %v880_v35 = vsel %vm550_vm2, %v824_v55, 0.0  ;;  %v886_v3 = vsel %vm550_vm2, %v826_v63, 0.0 }
 0x2c3   :  { %872 = vadd.xlane.f32.xlu0 %v871_v50  ;;  %v789_v47 = vpop.f32.mrb[25].mxu1  ;;  %v829_v53 = vmul.f32 %v2626_v62, %v3392_v37 }
 0x2c4   :  { %v828_v49 = vmul.f32 %v789_v47, %v3383_v30 }
 0x2c5   :  { %v895_v2 = vsel %vm550_vm2, %v829_v53, 0.0 }
 0x2c6   :  { %v892_v57 = vsel %vm550_vm2, %v828_v49, 0.0  ;;  %v2629_v58 = vpop.f32.mrb[26].mxu1 }
 0x2c7   :  { %878 = vadd.xlane.f32.xlu0 %v877_v54  ;;  %893 = vadd.xlane.f32.xlu1 %v892_v57  ;;  %v799_v59 = vpop.f32.mrb[27].mxu1  ;;  %v831_v5 = vmul.f32 %v2629_v58, %v3406_v32 }
 0x2c8   :  { %v830_v0 = vmul.f32 %v799_v59, %v3397_v38  ;;  %v929_v59 = vld [vmem:[%s4203_s3 + $0x8] sm:$0xff] }
 0x2c9   :  { %v901_v25 = vsel %vm550_vm2, %v831_v5, 0.0 }
 0x2ca   :  { %v898_v4 = vsel %vm550_vm2, %v830_v0, 0.0 }
 0x2cb   :  { %884 = vadd.xlane.f32.xlu0 %v883_v1  ;;  %896 = vadd.xlane.f32.xlu1 %v895_v2  ;;  %v928_v1 = vld [vmem:[%s4203_s3] sm:$0xff] }
 0x2cf   :  { %899 = vadd.xlane.f32.xlu1 %v898_v4 }
 0x2d3   :  { %902 = vadd.xlane.f32.xlu1 %v901_v25 }
 0x2d7   :  { %857 = vadd.xlane.f32.xlu1 %v856_v41  ;;  %v931_v41 = vld [vmem:[%s4203_s3 + $0x18] sm:$0xff] }
 0x2db   :  { %863 = vadd.xlane.f32.xlu1 %v862_v40 }
 0x2df   :  { %869 = vadd.xlane.f32.xlu1 %v868_v34  ;;  %v930_v34 = vld [vmem:[%s4203_s3 + $0x10] sm:$0xff] }
 0x2e3   :  { %875 = vadd.xlane.f32.xlu1 %v874_v31 }
 0x2e7   :  { %881 = vadd.xlane.f32.xlu1 %v880_v35  ;;  %v932_v35 = vld [vmem:[%s4203_s3 + $0x20] sm:$0xff] }
 0x2eb   :  { %887 = vadd.xlane.f32.xlu1 %v886_v3 }
 0x32b   :  { %v837_v19 = vpop.xlane.xlu1 %836 }
 0x32c   :  { %v905_v62 = vmul.f32 0.0012755102, %v837_v19  ;;  %v834_v50 = vpop.xlane.xlu0 %833 }
 0x32d   :  { %v904_v7 = vmul.f32 0.0012755102, %v834_v50 }
 0x32e   :  { %v953_v47 = vadd.f32 1e-05, %v905_v62 }
 0x32f   :  { %v952_v49 = vadd.f32 1e-05, %v904_v7 }
 0x330   :  { %2777 = vrsqrt.f32 %v953_v47  ;;  %v840_v52 = vpop.xlane.xlu0 %839 }
 0x331   :  { %2779 = vrsqrt.f32 %v952_v49  ;;  %v906_v61 = vmul.f32 0.0012755102, %v840_v52 }
 0x333   :  { %v954_v57 = vadd.f32 1e-05, %v906_v61 }
 0x334   :  { %v843_v53 = vpop.xlane.xlu0 %842 }
 0x335   :  { %v907_v54 = vmul.f32 0.0012755102, %v843_v53 }
 0x337   :  { %v955_v36 = vadd.f32 1e-05, %v907_v54 }
 0x338   :  { %v846_v58 = vpop.xlane.xlu0 %845 }
 0x339   :  { %2781 = vrsqrt.f32 %v955_v36  ;;  %v908_v0 = vmul.f32 0.0012755102, %v846_v58 }
 0x33a   :  { %v2778_v2 = vpop.eup %2777  ;;  %2783 = vrsqrt.f32 %v954_v57 }
 0x33b   :  { %v2780_v4 = vpop.eup %2779  ;;  %v956_v5 = vadd.f32 1e-05, %v908_v0  ;;  %v1001_v6 = vmul.f32 %v2778_v2, %v929_v59  ;;  %v947_v2 = vld [vmem:[%s4203_s3 + $0x98] sm:$0xff] }
 0x33c   :  { %v1000_v25 = vmul.f32 %v2780_v4, %v928_v1  ;;  %v849_v55 = vpop.xlane.xlu0 %848 }
 0x33d   :  { %1055 = vperm.xlu1 %2776, %v1001_v6   ;;  %2785 = vrsqrt.f32 %v956_v5  ;;  %v909_v53 = vmul.f32 0.0012755102, %v849_v55  ;;  %v948_v55 = vld [vmem:[%s4203_s3 + $0xa0] sm:$0xff] }
 0x33e   :  { %1050 = vperm.xlu0 %2775, %v1000_v25  }
 0x33f   :  { %v957_v59 = vadd.f32 1e-05, %v909_v53 }
 0x340   :  { %v852_v19 = vpop.xlane.xlu0 %851 }
 0x341   :  { %v910_v0 = vmul.f32 0.0012755102, %v852_v19 }
 0x343   :  { %v2782_v14 = vpop.eup %2781 }
 0x344   :  { %v1003_v40 = vmul.f32 %v2782_v14, %v931_v41  ;;  %v2784_v44 = vpop.eup %2783  ;;  %v855_v47 = vpop.xlane.xlu0 %854  ;;  %v958_v14 = vadd.f32 1e-05, %v910_v0  ;;  %v933_v0 = vld [vmem:[%s4203_s3 + $0x28] sm:$0xff] }
 0x345   :  { %v1002_v31 = vmul.f32 %v2784_v44, %v930_v34 }
 0x346   :  { %1065 = vperm.xlu1 %2776, %v1003_v40   ;;  %v911_v40 = vmul.f32 0.0012755102, %v855_v47  ;;  %v949_v47 = vld [vmem:[%s4203_s3 + $0xa8] sm:$0xff] }
 0x347   :  { %v2786_v63 = vpop.eup %2785 }
 0x348   :  { %v1004_v3 = vmul.f32 %v2786_v63, %v932_v35  ;;  %v861_v57 = vpop.xlane.xlu0 %860  ;;  %v959_v35 = vadd.f32 1e-05, %v911_v40 }
 0x34a   :  { %1060 = vperm.xlu1 %2776, %v1002_v31  }
 0x34c   :  { %v867_v6 = vpop.xlane.xlu0 %866 }
 0x34d   :  { %v915_v53 = vmul.f32 0.0012755102, %v867_v6 }
 0x34e   :  { %1070 = vperm.xlu1 %2776, %v1004_v3   ;;  %v913_v3 = vmul.f32 0.0012755102, %v861_v57  ;;  %v950_v57 = vld [vmem:[%s4203_s3 + $0xb0] sm:$0xff] }
 0x34f   :  { %v891_v62 = vpop.xlane.xlu1 %890 }
 0x350   :  { %v923_v50 = vmul.f32 0.0012755102, %v891_v62  ;;  %v873_v62 = vpop.xlane.xlu0 %872 }
 0x351   :  { %v917_v6 = vmul.f32 0.0012755102, %v873_v62 }
 0x352   :  { %v971_v7 = vadd.f32 1e-05, %v923_v50 }
 0x354   :  { %2787 = vrsqrt.f32 %v971_v7  ;;  %v894_v49 = vpop.xlane.xlu1 %893 }
 0x355   :  { %v924_v52 = vmul.f32 0.0012755102, %v894_v49 }
 0x357   :  { %v972_v61 = vadd.f32 1e-05, %v924_v52 }
 0x358   :  { %v897_v54 = vpop.xlane.xlu1 %896 }
 0x359   :  { %v925_v36 = vmul.f32 0.0012755102, %v897_v54  ;;  %2789 = vrsqrt.f32 %v972_v61  ;;  %v961_v61 = vadd.f32 1e-05, %v913_v3 }
 0x35b   :  { %v973_v58 = vadd.f32 1e-05, %v925_v36 }
 0x35c   :  { %v900_v1 = vpop.xlane.xlu1 %899 }
 0x35d   :  { %v926_v4 = vmul.f32 0.0012755102, %v900_v1  ;;  %2791 = vrsqrt.f32 %v973_v58 }
 0x35e   :  { %v2788_v5 = vpop.eup %2787  ;;  %2793 = vrsqrt.f32 %v957_v59 }
 0x35f   :  { %v974_v25 = vadd.f32 1e-05, %v926_v4  ;;  %v1019_v41 = vmul.f32 %v2788_v5, %v947_v2  ;;  %v879_v2 = vpop.xlane.xlu0 %878  ;;  %v963_v5 = vadd.f32 1e-05, %v915_v53 }
 0x360   :  { %v903_v44 = vpop.xlane.xlu1 %902  ;;  %v919_v3 = vmul.f32 0.0012755102, %v879_v2  ;;  %v938_v2 = vld [vmem:[%s4203_s3 + $0x50] sm:$0xff] }
 0x361   :  { %2795 = vrsqrt.f32 %v974_v25  ;;  %v927_v34 = vmul.f32 0.0012755102, %v903_v44  ;;  %1145 = vperm.xlu1 %2776, %v1019_v41   ;;  %v951_v44 = vld [vmem:[%s4203_s3 + $0xb8] sm:$0xff] }
 0x362   :  { %2797 = vrsqrt.f32 %v958_v14 }
 0x363   :  { %v975_v31 = vadd.f32 1e-05, %v927_v34  ;;  %v2790_v63 = vpop.eup %2789 }
 0x364   :  { %v858_v19 = vpop.xlane.xlu1 %857  ;;  %v1020_v7 = vmul.f32 %v2790_v63, %v948_v55  ;;  %v934_v55 = vld [vmem:[%s4203_s3 + $0x30] sm:$0xff] }
 0x365   :  { %2799 = vrsqrt.f32 %v975_v31  ;;  %v912_v50 = vmul.f32 0.0012755102, %v858_v19 }
 0x366   :  { %1150 = vperm.xlu1 %2776, %v1020_v7   ;;  %2801 = vrsqrt.f32 %v959_v35  ;;  %v965_v35 = vadd.f32 1e-05, %v917_v6 }
 0x367   :  { %v960_v49 = vadd.f32 1e-05, %v912_v50  ;;  %v2792_v52 = vpop.eup %2791  ;;  %v885_v50 = vpop.xlane.xlu0 %884 }
 0x368   :  { %v864_v54 = vpop.xlane.xlu1 %863  ;;  %v1021_v58 = vmul.f32 %v2792_v52, %v949_v47  ;;  %v2794_v59 = vpop.eup %2793 }
 0x369   :  { %2803 = vrsqrt.f32 %v960_v49  ;;  %v914_v36 = vmul.f32 0.0012755102, %v864_v54  ;;  %v1005_v40 = vmul.f32 %v2794_v59, %v933_v0  ;;  %v936_v49 = vld [vmem:[%s4203_s3 + $0x40] sm:$0xff] }
 0x36a   :  { %1155 = vperm.xlu1 %2776, %v1021_v58   ;;  %2805 = vrsqrt.f32 %v961_v61  ;;  %v935_v61 = vld [vmem:[%s4203_s3 + $0x38] sm:$0xff]  ;;  %v921_v58 = vmul.f32 0.0012755102, %v885_v50  ;;  %v942_v50 = vld [vmem:[%s4203_s3 + $0x70] sm:$0xff] }
 0x36b   :  { %v2796_v1 = vpop.eup %2795  ;;  %v962_v4 = vadd.f32 1e-05, %v914_v36  ;;  %v967_v36 = vadd.f32 1e-05, %v919_v3 }
 0x36c   :  { %v870_v25 = vpop.xlane.xlu1 %869  ;;  %v1022_v41 = vmul.f32 %v2796_v1, %v950_v57  ;;  %v2798_v34 = vpop.eup %2797 }
 0x36d   :  { %2807 = vrsqrt.f32 %v962_v4  ;;  %v916_v14 = vmul.f32 0.0012755102, %v870_v25  ;;  %v1006_v47 = vmul.f32 %v2798_v34, %v934_v55  ;;  %v940_v55 = vld [vmem:[%s4203_s3 + $0x60] sm:$0xff] }
 0x36e   :  { %1160 = vperm.xlu0 %2775, %v1022_v41   ;;  %1075 = vperm.xlu1 %2776, %v1005_v40   ;;  %2809 = vrsqrt.f32 %v963_v5  ;;  %v937_v5 = vld [vmem:[%s4203_s3 + $0x48] sm:$0xff]  ;;  %v969_v41 = vadd.f32 1e-05, %v921_v58 }
 0x36f   :  { %v2800_v31 = vpop.eup %2799  ;;  %v964_v63 = vadd.f32 1e-05, %v916_v14 }
 0x370   :  { %v876_v19 = vpop.xlane.xlu1 %875  ;;  %v1023_v62 = vmul.f32 %v2800_v31, %v951_v44  ;;  %v2802_v52 = vpop.eup %2801 }
 0x371   :  { %2811 = vrsqrt.f32 %v964_v63  ;;  %v918_v7 = vmul.f32 0.0012755102, %v876_v19  ;;  %v1007_v1 = vmul.f32 %v2802_v52, %v935_v61  ;;  %v939_v63 = vld [vmem:[%s4203_s3 + $0x58] sm:$0xff] }
 0x372   :  { %1165 = vperm.xlu0 %2775, %v1023_v62   ;;  %1080 = vperm.xlu1 %2776, %v1006_v47   ;;  %2813 = vrsqrt.f32 %v965_v35  ;;  %v941_v47 = vld [vmem:[%s4203_s3 + $0x68] sm:$0xff] }
 0x373   :  { %v2804_v53 = vpop.eup %2803  ;;  %v966_v54 = vadd.f32 1e-05, %v918_v7 }
 0x374   :  { %v882_v57 = vpop.xlane.xlu1 %881  ;;  %v1008_v59 = vmul.f32 %v2804_v53, %v936_v49  ;;  %v2806_v4 = vpop.eup %2805  ;;  %v944_v53 = vld [vmem:[%s4203_s3 + $0x80] sm:$0xff] }
 0x375   :  { %2815 = vrsqrt.f32 %v966_v54  ;;  %v920_v0 = vmul.f32 0.0012755102, %v882_v57  ;;  %v1009_v34 = vmul.f32 %v2806_v4, %v937_v5 }
 0x376   :  { %1090 = vperm.xlu0 %2775, %v1008_v59   ;;  %1085 = vperm.xlu1 %2776, %v1007_v1   ;;  %2817 = vrsqrt.f32 %v967_v36  ;;  %v943_v36 = vld [vmem:[%s4203_s3 + $0x78] sm:$0xff] }
 0x377   :  { %v2808_v6 = vpop.eup %2807  ;;  %v968_v25 = vadd.f32 1e-05, %v920_v0  ;;  %v946_v0 = vld [vmem:[%s4203_s3 + $0x90] sm:$0xff] }
 0x378   :  { %v888_v14 = vpop.xlane.xlu1 %887  ;;  %v1010_v40 = vmul.f32 %v2808_v6, %v938_v2  ;;  %v2810_v31 = vpop.eup %2809  ;;  %v945_v2 = vld [vmem:[%s4203_s3 + $0x88] sm:$0xff] }
 0x379   :  { %2819 = vrsqrt.f32 %v968_v25  ;;  %v922_v44 = vmul.f32 0.0012755102, %v888_v14  ;;  %v1011_v62 = vmul.f32 %v2810_v31, %v939_v63  ;;  %v1025_v25 = vld [vmem:[%s4204_s4 + $0x8] sm:$0xff]  ;;  %v1027_v14 = vld [vmem:[%s4204_s4 + $0x18] sm:$0xff]  ;;  %v1030_v31 = vld [vmem:[%s4204_s4 + $0x30] sm:$0xff] }
 0x37a   :  { %1100 = vperm.xlu0 %2775, %v1010_v40   ;;  %1095 = vperm.xlu1 %2776, %v1009_v34   ;;  %2821 = vrsqrt.f32 %v969_v41  ;;  %v1024_v41 = vld [vmem:[%s4204_s4] sm:$0xff]  ;;  %v1026_v40 = vld [vmem:[%s4204_s4 + $0x10] sm:$0xff]  ;;  %v1033_v63 = vld [vmem:[%s4204_s4 + $0x48] sm:$0xff] }
 0x37b   :  { %v2812_v35 = vpop.eup %2811  ;;  %v970_v3 = vadd.f32 1e-05, %v922_v44  ;;  %v1029_v44 = vld [vmem:[%s4204_s4 + $0x28] sm:$0xff]  ;;  %v1028_v34 = vld [vmem:[%s4204_s4 + $0x20] sm:$0xff] }
 0x37c   :  { %v1012_v19 = vmul.f32 %v2812_v35, %v940_v55  ;;  %v2814_v7 = vpop.eup %2813  ;;  %v1031_v55 = vld [vmem:[%s4204_s4 + $0x38] sm:$0xff]  ;;  %v1032_v35 = vld [vmem:[%s4204_s4 + $0x40] sm:$0xff] }
 0x37d   :  { %2823 = vrsqrt.f32 %v970_v3  ;;  %v1013_v61 = vmul.f32 %v2814_v7, %v941_v47  ;;  %v1035_v3 = vld [vmem:[%s4204_s4 + $0x58] sm:$0xff]  ;;  %v1038_v47 = vld [vmem:[%s4204_s4 + $0x70] sm:$0xff] }
 0x37e   :  { %1110 = vperm.xlu0 %2775, %v1012_v19   ;;  %1105 = vperm.xlu1 %2776, %v1011_v62   ;;  %v1034_v19 = vld [vmem:[%s4204_s4 + $0x50] sm:$0xff]  ;;  %v1037_v62 = vld [vmem:[%s4204_s4 + $0x68] sm:$0xff]  ;;  %v1039_v7 = vld [vmem:[%s4204_s4 + $0x78] sm:$0xff] }
 0x37f   :  { %v2816_v49 = vpop.eup %2815 }
 0x380   :  { %v1014_v52 = vmul.f32 %v2816_v49, %v942_v50  ;;  %v2818_v54 = vpop.eup %2817  ;;  %v1036_v50 = vld [vmem:[%s4204_s4 + $0x60] sm:$0xff]  ;;  %v1041_v49 = vld [vmem:[%s4204_s4 + $0x88] sm:$0xff] }
 0x381   :  { %v1015_v59 = vmul.f32 %v2818_v54, %v943_v36  ;;  %v1045_v54 = vld [vmem:[%s4204_s4 + $0xa8] sm:$0xff]  ;;  %v1044_v36 = vld [vmem:[%s4204_s4 + $0xa0] sm:$0xff] }
 0x382   :  { %1120 = vperm.xlu0 %2775, %v1014_v52   ;;  %1115 = vperm.xlu1 %2776, %v1013_v61   ;;  %v1040_v52 = vld [vmem:[%s4204_s4 + $0x80] sm:$0xff]  ;;  %v1043_v61 = vld [vmem:[%s4204_s4 + $0x98] sm:$0xff] }
 0x383   :  { %v2820_v58 = vpop.eup %2819 }
 0x384   :  { %v1016_v57 = vmul.f32 %v2820_v58, %v944_v53  ;;  %v2822_v1 = vpop.eup %2821  ;;  %v1042_v53 = vld [vmem:[%s4204_s4 + $0x90] sm:$0xff]  ;;  %v1047_v58 = vld [vmem:[%s4204_s4 + $0xb8] sm:$0xff] }
 0x385   :  { %v1017_v6 = vmul.f32 %v2822_v1, %v945_v2 }
 0x386   :  { %1130 = vperm.xlu0 %2775, %v1016_v57   ;;  %1125 = vperm.xlu1 %2776, %v1015_v59   ;;  %v1046_v57 = vld [vmem:[%s4204_s4 + $0xb0] sm:$0xff]  ;;  %s2851_s4 = smov [#allocation2]  }
 0x387   :  { %v2824_v4 = vpop.eup %2823  ;;  %s2369_s6 = sshll.u32 %s2851_s4, 4  ;;  %s2370_s6 = int_to_ptr.vmem [resolvable:$true] %s2369_s6 }
 0x388   :  { %v1018_v5 = vmul.f32 %v2824_v4, %v946_v0  ;;  %s2825_s7 = scalar_lea.vmem %s2370_s6, 21504  ;;  %p2830_p1 = scmp.lt.s32.totalorder %s2370_s6, %s2370_s6 }
 0x389   :  { %p2826_p0 = scmp.ne.s32.totalorder %s2370_s6, %s2825_s7  ;;  %p2831_p2 = scmp.lt.s32.totalorder %s2825_s7, %s2825_s7 }
 0x38a   :  { %1140 = vperm.xlu0 %2775, %v1018_v5   ;;  %1135 = vperm.xlu1 %2776, %v1017_v6  }
 0x38b   :  { %p2832_p3 = por %p2831_p2, %p2830_p1 }
 0x38d   :  { %p2833_p4 = pnand %p2832_p3, %p2826_p0 }
 0x38e   :  { %1199 = vperm.xlu0 %2775, %v1025_v25   ;;  %1194 = vperm.xlu1 %2776, %v1024_v41  }
 0x392   :  { %1209 = vperm.xlu0 %2775, %v1027_v14   ;;  %1204 = vperm.xlu1 %2776, %v1026_v40  }
 0x396   :  { %1219 = vperm.xlu0 %2775, %v1029_v44   ;;  %1214 = vperm.xlu1 %2776, %v1028_v34  }
 0x39a   :  { %1229 = vperm.xlu0 %2775, %v1031_v55   ;;  %1224 = vperm.xlu1 %2776, %v1030_v31  }
 0x39e   :  { %1239 = vperm.xlu0 %2775, %v1033_v63   ;;  %1234 = vperm.xlu1 %2776, %v1032_v35  }
 0x3a2   :  { %1249 = vperm.xlu0 %2775, %v1035_v3   ;;  %1244 = vperm.xlu1 %2776, %v1034_v19  }
 0x3a6   :  { %1259 = vperm.xlu0 %2775, %v1037_v62   ;;  %1254 = vperm.xlu1 %2776, %v1036_v50  }
 0x3aa   :  { %1269 = vperm.xlu0 %2775, %v1039_v7   ;;  %1264 = vperm.xlu1 %2776, %v1038_v47  }
 0x3ae   :  { %1279 = vperm.xlu0 %2775, %v1041_v49   ;;  %1274 = vperm.xlu1 %2776, %v1040_v52  }
 0x3b2   :  { %1289 = vperm.xlu0 %2775, %v1043_v61   ;;  %1284 = vperm.xlu1 %2776, %v1042_v53  }
 0x3b6   :  { %1299 = vperm.xlu0 %2775, %v1045_v54   ;;  %1294 = vperm.xlu1 %2776, %v1044_v36  }
 0x3ba   :  { %1309 = vperm.xlu0 %2775, %v1047_v58   ;;  %1304 = vperm.xlu1 %2776, %v1046_v57  }
 0x3bc   :  { %v1056_v1 = vpop.permute.xlu1 %1055 }
 0x3bd   :  { %v1051_v59 = vpop.permute.xlu0 %1050  ;;  %v3612_v2 = vmul.f32 %v1056_v1, %v3247_v8 }
 0x3be   :  { %v3605_v0 = vmul.f32 %v1051_v59, %v3240_v23 }
 0x3c0   :  { %2412 = vmatmul.mubr.msk.f32.vlgmr.msra.gmra.mrb[8].mxu0 %vm550_vm2, %v3605_v0 }
 0x3c1   :  { %2737 = vmatpush1.bf16.msra.mxu0 %v3221_v45  ;;  %1454 = vmatprep.mubr.f32.mxu0 %v2850_v15 }
 0x3c2   :  { %2739 = vmatprep.subr.bf16.mxu0 %v3223_v46 }
 0x3c4   :  { %2413 = vmatmul.mubr.msk.f32.gmra.mrb[10].mxu0 %vm550_vm2, %v3612_v2 }
 0x3c5   :  { %2741 = vmatpush1.bf16.msra.mxu0 %v3230_v48  ;;  %v1066_v23 = vpop.permute.xlu1 %1065  ;;  %1460 = vmatprep.mubr.f32.mxu0 %v2850_v15 }
 0x3c6   :  { %v3626_v45 = vmul.f32 %v1066_v23, %v3263_v12 }
 0x3c9   :  { %v1061_v4 = vpop.permute.xlu1 %1060 }
 0x3ca   :  { %v3620_v5 = vmul.f32 %v1061_v4, %v3253_v11 }
 0x3cc   :  { %2414 = vmatmul.mubr.msk.f32.gmra.mrb[12].mxu0 %vm550_vm2, %v3620_v5 }
 0x3cd   :  { %1466 = vmatprep.mubr.f32.mxu0 %v2850_v15  ;;  %v1071_v46 = vpop.permute.xlu1 %1070 }
 0x3ce   :  { %v3632_v48 = vmul.f32 %v1071_v46, %v3269_v13 }
 0x3d0   :  { %2415 = vmatmul.mubr.msk.f32.gmra.mrb[14].mxu0 %vm550_vm2, %v3626_v45 }
 0x3d1   :  { %1472 = vmatprep.mubr.f32.mxu0 %v2850_v15 }
 0x3d4   :  { %2416 = vmatmul.mubr.msk.f32.gmra.mrb[16].mxu0 %vm550_vm2, %v3632_v48 }
 0x3d5   :  { %1478 = vmatprep.mubr.f32.mxu0 %v2850_v15 }
 0x3e0   :  { %v1146_v8 = vpop.permute.xlu1 %1145 }
 0x3e1   :  { %v3638_v11 = vmul.f32 %v1146_v8, %v3378_v26 }
 0x3e3   :  { %2431 = vmatmul.mubr.msk.f32.vlgmr.msra.gmra.mrb[28].mxu1 %vm550_vm2, %v3638_v11 }
 0x3e4   :  { %2729 = vmatpush1.bf16.msra.mxu1 %v3197_v39  ;;  %1568 = vmatprep.mubr.f32.mxu1 %v2850_v15 }
 0x3e5   :  { %2731 = vmatprep.subr.bf16.mxu1 %v3200_v42  ;;  %v1151_v12 = vpop.permute.xlu1 %1150 }
 0x3e6   :  { %v3646_v13 = vmul.f32 %v1151_v12, %v3383_v30 }
 0x3e8   :  { %2733 = vmatpush1.bf16.msra.mxu1 %v3212_v43 }
 0x3e9   :  { %2432 = vmatmul.mubr.msk.f32.gmra.mrb[30].mxu1 %vm550_vm2, %v3646_v13  ;;  %2743 = vmatprep.subr.bf16.mxu1 %v3156_v21  ;;  %v1156_v26 = vpop.permute.xlu1 %1155 }
 0x3ea   :  { %1574 = vmatprep.mubr.f32.mxu1 %v2850_v15  ;;  %v3654_v39 = vmul.f32 %v1156_v26, %v3392_v37 }
 0x3ed   :  { %2433 = vmatmul.mubr.msk.f32.gmra.mrb[32].mxu1 %vm550_vm2, %v3654_v39  ;;  %v1161_v42 = vpop.permute.xlu0 %1160  ;;  %v1076_v6 = vpop.permute.xlu1 %1075 }
 0x3ee   :  { %v3659_v30 = vmul.f32 %v1161_v42, %v3397_v38  ;;  %1580 = vmatprep.mubr.f32.mxu1 %v2850_v15  ;;  %v3663_v43 = vmul.f32 %v1076_v6, %v3279_v16 }
 0x3f0   :  { %2417 = vmatmul.mubr.msk.f32.gmra.mrb[18].mxu0 %vm550_vm2, %v3663_v43 }
 0x3f1   :  { %2434 = vmatmul.mubr.msk.f32.gmra.mrb[34].mxu1 %vm550_vm2, %v3659_v30  ;;  %v1166_v37 = vpop.permute.xlu0 %1165  ;;  %v1081_v41 = vpop.permute.xlu1 %1080  ;;  %1484 = vmatprep.mubr.f32.mxu0 %v2850_v15 }
 0x3f2   :  { %v3670_v25 = vmul.f32 %v1166_v37, %v3406_v32  ;;  %1586 = vmatprep.mubr.f32.mxu1 %v2850_v15  ;;  %v3675_v38 = vmul.f32 %v1081_v41, %v3285_v17 }
 0x3f4   :  { %2418 = vmatmul.mubr.msk.f32.gmra.mrb[20].mxu0 %vm550_vm2, %v3675_v38 }
 0x3f5   :  { %2435 = vmatmul.mubr.msk.f32.gmra.mrb[36].mxu1 %vm550_vm2, %v3670_v25  ;;  %v1086_v16 = vpop.permute.xlu1 %1085  ;;  %1490 = vmatprep.mubr.f32.mxu0 %v2850_v15  ;;  %v1091_v14 = vpop.permute.xlu0 %1090 }
 0x3f6   :  { %1657 = vmatprep.mubr.f32.mxu1 %v2850_v15  ;;  %v3684_v32 = vmul.f32 %v1086_v16, %v3294_v10  ;;  %v3693_v17 = vmul.f32 %v1091_v14, %v3299_v24 }
 0x3f8   :  { %2419 = vmatmul.mubr.msk.f32.gmra.mrb[22].mxu0 %vm550_vm2, %v3684_v32 }
 0x3f9   :  { %2436 = vmatmul.mubr.msk.f32.vlgmr.msra.gmra.mrb[38].mxu1 %vm550_vm2, %v3605_v0  ;;  %1496 = vmatprep.mubr.f32.mxu0 %v2850_v15  ;;  %v1096_v10 = vpop.permute.xlu1 %1095  ;;  %v1101_v24 = vpop.permute.xlu0 %1100 }
 0x3fa   :  { %2745 = vmatpush3.bf16.msra.mxu1 %v3156_v21  ;;  %1663 = vmatprep.mubr.f32.mxu1 %v2850_v15  ;;  %v3704_v21 = vmul.f32 %v1096_v10, %v3308_v18 }
 0x3fb   :  { %2747 = vmatprep.subr.bf16.mxu1 %v3170_v51 }
 0x3fc   :  { %2420 = vmatmul.mubr.msk.f32.gmra.mrb[24].mxu0 %vm550_vm2, %v3693_v17 }
 0x3fd   :  { %2437 = vmatmul.mubr.msk.f32.gmra.mrb[40].mxu1 %vm550_vm2, %v3612_v2  ;;  %1502 = vmatprep.mubr.f32.mxu0 %v2850_v15  ;;  %v1106_v40 = vpop.permute.xlu1 %1105  ;;  %v1111_v44 = vpop.permute.xlu0 %1110 }
 0x3fe   :  { %2749 = vmatpush3.bf16.msra.mxu1 %v3170_v51  ;;  %1669 = vmatprep.mubr.f32.mxu1 %v2850_v15  ;;  %v3714_v51 = vmul.f32 %v1101_v24, %v3313_v20  ;;  %v3723_v18 = vmul.f32 %v1106_v40, %v3322_v60  ;;  %v3732_v20 = vmul.f32 %v1111_v44, %v3327_v9 }
 0x400   :  { %2421 = vmatmul.mubr.msk.f32.gmra.mrb[26].mxu0 %vm550_vm2, %v3704_v21 }
 0x401   :  { %2438 = vmatmul.mubr.msk.f32.gmra.mrb[42].mxu1 %vm550_vm2, %v3620_v5  ;;  %1508 = vmatprep.mubr.f32.mxu0 %v2850_v15  ;;  %v1116_v34 = vpop.permute.xlu1 %1115  ;;  %v1121_v55 = vpop.permute.xlu0 %1120 }
 0x402   :  { %1675 = vmatprep.mubr.f32.mxu1 %v2850_v15  ;;  %v3741_v60 = vmul.f32 %v1116_v34, %v3336_v22  ;;  %v3750_v9 = vmul.f32 %v1121_v55, %v3341_v56 }
 0x404   :  { %2422 = vmatmul.mubr.msk.f32.gmra.mrb[28].mxu0 %vm550_vm2, %v3714_v51 }
 0x405   :  { %2439 = vmatmul.mubr.msk.f32.gmra.mrb[44].mxu1 %vm550_vm2, %v3626_v45  ;;  %1514 = vmatprep.mubr.f32.mxu0 %v2850_v15  ;;  %v1126_v31 = vpop.permute.xlu1 %1125  ;;  %v1131_v63 = vpop.permute.xlu0 %1130 }
 0x406   :  { %1681 = vmatprep.mubr.f32.mxu1 %v2850_v15  ;;  %v3759_v22 = vmul.f32 %v1126_v31, %v3350_v27  ;;  %v3768_v56 = vmul.f32 %v1131_v63, %v3355_v33 }
 0x408   :  { %2423 = vmatmul.mubr.msk.f32.gmra.mrb[30].mxu0 %vm550_vm2, %v3723_v18 }
 0x409   :  { %2440 = vmatmul.mubr.msk.f32.gmra.mrb[46].mxu1 %vm550_vm2, %v3632_v48  ;;  %1520 = vmatprep.mubr.f32.mxu0 %v2850_v15  ;;  %v1136_v35 = vpop.permute.xlu1 %1135  ;;  %v1141_v3 = vpop.permute.xlu0 %1140 }
 0x40a   :  { %1687 = vmatprep.mubr.f32.mxu1 %v2850_v15  ;;  %v3777_v27 = vmul.f32 %v1136_v35, %v3364_v28  ;;  %v3786_v33 = vmul.f32 %v1141_v3, %v3369_v29 }
 0x40c   :  { %2424 = vmatmul.mubr.msk.f32.gmra.mrb[32].mxu0 %vm550_vm2, %v3732_v20 }
 0x40d   :  { %2441 = vmatmul.mubr.msk.f32.gmra.mrb[48].mxu1 %vm550_vm2, %v3663_v43  ;;  %1526 = vmatprep.mubr.f32.mxu0 %v2850_v15  ;;  %v3937_v28 = vpop.permute.xlu0 %1199  ;;  %v3939_v29 = vpop.permute.xlu1 %1194 }
 0x40e   :  { %1693 = vmatprep.mubr.f32.mxu1 %v2850_v15 }
 0x410   :  { %2425 = vmatmul.mubr.msk.f32.gmra.mrb[34].mxu0 %vm550_vm2, %v3741_v60 }
 0x411   :  { %2442 = vmatmul.mubr.msk.f32.gmra.mrb[50].mxu1 %vm550_vm2, %v3675_v38  ;;  %1532 = vmatprep.mubr.f32.mxu0 %v2850_v15  ;;  %v3948_v19 = vpop.permute.xlu0 %1209  ;;  %v3954_v62 = vpop.permute.xlu1 %1204 }
 0x412   :  { %1699 = vmatprep.mubr.f32.mxu1 %v2850_v15 }
 0x414   :  { %2426 = vmatmul.mubr.msk.f32.gmra.mrb[36].mxu0 %vm550_vm2, %v3750_v9 }
 0x415   :  { %2443 = vmatmul.mubr.msk.f32.gmra.mrb[52].mxu1 %vm550_vm2, %v3684_v32  ;;  %1538 = vmatprep.mubr.f32.mxu0 %v2850_v15  ;;  %v3956_v50 = vpop.permute.xlu0 %1219  ;;  %v3958_v7 = vpop.permute.xlu1 %1214 }
 0x416   :  { %1705 = vmatprep.mubr.f32.mxu1 %v2850_v15 }
 0x418   :  { %2427 = vmatmul.mubr.msk.f32.gmra.mrb[38].mxu0 %vm550_vm2, %v3759_v22 }
 0x419   :  { %2444 = vmatmul.mubr.msk.f32.gmra.mrb[54].mxu1 %vm550_vm2, %v3693_v17  ;;  %1544 = vmatprep.mubr.f32.mxu0 %v2850_v15  ;;  %v3960_v47 = vpop.permute.xlu0 %1229  ;;  %v3962_v49 = vpop.permute.xlu1 %1224 }
 0x41a   :  { %1711 = vmatprep.mubr.f32.mxu1 %v2850_v15 }
 0x41c   :  { %2428 = vmatmul.mubr.msk.f32.gmra.mrb[40].mxu0 %vm550_vm2, %v3768_v56 }
 0x41d   :  { %2445 = vmatmul.mubr.msk.f32.gmra.mrb[56].mxu1 %vm550_vm2, %v3704_v21  ;;  %1550 = vmatprep.mubr.f32.mxu0 %v2850_v15  ;;  %v3966_v54 = vpop.permute.xlu0 %1239  ;;  %v3968_v58 = vpop.permute.xlu1 %1234 }
 0x41e   :  { %1717 = vmatprep.mubr.f32.mxu1 %v2850_v15 }
 0x420   :  { %2429 = vmatmul.mubr.msk.f32.gmra.mrb[42].mxu0 %vm550_vm2, %v3777_v27 }
 0x421   :  { %2446 = vmatmul.mubr.msk.f32.gmra.mrb[58].mxu1 %vm550_vm2, %v3714_v51  ;;  %1556 = vmatprep.mubr.f32.mxu0 %v2850_v15  ;;  %v3972_v1 = vpop.permute.xlu0 %1249 }
 0x422   :  { %1723 = vmatprep.mubr.f32.mxu1 %v2850_v15 }
 0x424   :  { %2430 = vmatmul.mubr.msk.f32.gmra.mrb[44].mxu0 %vm550_vm2, %v3786_v33 }
 0x425   :  { %2447 = vmatmul.mubr.msk.f32.gmra.mrb[60].mxu1 %vm550_vm2, %v3723_v18  ;;  %1866 = vmatprep.mubr.f32.mxu0 %v2850_v15  ;;  %v3978_v46 = vpop.permute.xlu0 %1259 }
 0x426   :  { %1729 = vmatprep.mubr.f32.mxu1 %v2850_v15 }
 0x428   :  { %2460 = vmatmul.mubr.msk.f32.vlgmr.msra.gmra.mrb[46].mxu0 %vm550_vm2, %v3605_v0 }
 0x429   :  { %2448 = vmatmul.mubr.msk.f32.gmra.mrb[62].mxu1 %vm550_vm2, %v3732_v20  ;;  %1872 = vmatprep.mubr.f32.mxu0 %v2850_v15 }
 0x42a   :  { %1735 = vmatprep.mubr.f32.mxu1 %v2850_v15 }
 0x42c   :  { %2461 = vmatmul.mubr.msk.f32.gmra.mrb[48].mxu0 %vm550_vm2, %v3612_v2 }
 0x42d   :  { %2449 = vmatmul.mubr.msk.f32.gmra.mrb[64].mxu1 %vm550_vm2, %v3741_v60  ;;  %1878 = vmatprep.mubr.f32.mxu0 %v2850_v15 }
 0x42e   :  { %1741 = vmatprep.mubr.f32.mxu1 %v2850_v15 }
 0x430   :  { %2462 = vmatmul.mubr.msk.f32.gmra.mrb[50].mxu0 %vm550_vm2, %v3620_v5 }
 0x431   :  { %2450 = vmatmul.mubr.msk.f32.gmra.mrb[66].mxu1 %vm550_vm2, %v3750_v9  ;;  %1884 = vmatprep.mubr.f32.mxu0 %v2850_v15 }
 0x432   :  { %1747 = vmatprep.mubr.f32.mxu1 %v2850_v15 }
 0x434   :  { %2463 = vmatmul.mubr.msk.f32.gmra.mrb[52].mxu0 %vm550_vm2, %v3626_v45 }
 0x435   :  { %2451 = vmatmul.mubr.msk.f32.gmra.mrb[68].mxu1 %vm550_vm2, %v3759_v22  ;;  %1890 = vmatprep.mubr.f32.mxu0 %v2850_v15 }
 0x436   :  { %1753 = vmatprep.mubr.f32.mxu1 %v2850_v15 }
 0x438   :  { %2464 = vmatmul.mubr.msk.f32.gmra.mrb[54].mxu0 %vm550_vm2, %v3632_v48 }
 0x439   :  { %2452 = vmatmul.mubr.msk.f32.gmra.mrb[70].mxu1 %vm550_vm2, %v3768_v56  ;;  %1896 = vmatprep.mubr.f32.mxu0 %v2850_v15 }
 0x43a   :  { %1759 = vmatprep.mubr.f32.mxu1 %v2850_v15 }
 0x43c   :  { %2465 = vmatmul.mubr.msk.f32.gmra.mrb[56].mxu0 %vm550_vm2, %v3663_v43 }
 0x43d   :  { %2453 = vmatmul.mubr.msk.f32.gmra.mrb[72].mxu1 %vm550_vm2, %v3777_v27  ;;  %1902 = vmatprep.mubr.f32.mxu0 %v2850_v15 }
 0x43e   :  { %1765 = vmatprep.mubr.f32.mxu1 %v2850_v15 }
 0x440   :  { %2466 = vmatmul.mubr.msk.f32.gmra.mrb[58].mxu0 %vm550_vm2, %v3675_v38 }
 0x441   :  { %2454 = vmatmul.mubr.msk.f32.gmra.mrb[74].mxu1 %vm550_vm2, %v3786_v33  ;;  %1908 = vmatprep.mubr.f32.mxu0 %v2850_v15 }
 0x442   :  { %1771 = vmatprep.mubr.f32.mxu1 %v2850_v15 }
 0x444   :  { %2467 = vmatmul.mubr.msk.f32.gmra.mrb[60].mxu0 %vm550_vm2, %v3684_v32 }
 0x445   :  { %2455 = vmatmul.mubr.msk.f32.gmra.mrb[76].mxu1 %vm550_vm2, %v3638_v11  ;;  %1914 = vmatprep.mubr.f32.mxu0 %v2850_v15 }
 0x446   :  { %1777 = vmatprep.mubr.f32.mxu1 %v2850_v15 }
 0x448   :  { %2468 = vmatmul.mubr.msk.f32.gmra.mrb[62].mxu0 %vm550_vm2, %v3693_v17 }
 0x449   :  { %2456 = vmatmul.mubr.msk.f32.gmra.mrb[78].mxu1 %vm550_vm2, %v3646_v13  ;;  %1920 = vmatprep.mubr.f32.mxu0 %v2850_v15 }
 0x44a   :  { %1783 = vmatprep.mubr.f32.mxu1 %v2850_v15 }
 0x44c   :  { %2469 = vmatmul.mubr.msk.f32.gmra.mrb[64].mxu0 %vm550_vm2, %v3704_v21 }
 0x44d   :  { %2457 = vmatmul.mubr.msk.f32.gmra.mrb[80].mxu1 %vm550_vm2, %v3654_v39  ;;  %1926 = vmatprep.mubr.f32.mxu0 %v2850_v15 }
 0x44e   :  { %1789 = vmatprep.mubr.f32.mxu1 %v2850_v15 }
 0x450   :  { %2470 = vmatmul.mubr.msk.f32.gmra.mrb[66].mxu0 %vm550_vm2, %v3714_v51 }
 0x451   :  { %2458 = vmatmul.mubr.msk.f32.gmra.mrb[82].mxu1 %vm550_vm2, %v3659_v30  ;;  %1932 = vmatprep.mubr.f32.mxu0 %v2850_v15 }
 0x452   :  { %1795 = vmatprep.mubr.f32.mxu1 %v2850_v15 }
 0x454   :  { %2471 = vmatmul.mubr.msk.f32.gmra.mrb[68].mxu0 %vm550_vm2, %v3723_v18 }
 0x455   :  { %2459 = vmatmul.mubr.msk.f32.gmra.mrb[84].mxu1 %vm550_vm2, %v3670_v25  ;;  %1938 = vmatprep.mubr.f32.mxu0 %v2850_v15 }
 0x456   :  { %2638 = vmatprep.mubr.msk.f32.mxu1 %vm550_vm2, %v3605_v0 }
 0x458   :  { %2472 = vmatmul.mubr.msk.f32.gmra.mrb[70].mxu0 %vm550_vm2, %v3732_v20 }
 0x459   :  { %2639 = vmatmul.mubr.msk.f32.vlgmr.msra.gmra.mrb[86].mxu1 %vm550_vm2, %v3612_v2  ;;  %1944 = vmatprep.mubr.f32.mxu0 %v2850_v15  ;;  %v3974_v2 = vpop.permute.xlu1 %1244 }
 0x45a   :  { %2641 = vmatprep.mubr.msk.f32.mxu1 %vm550_vm2, %v3620_v5 }
 0x45c   :  { %2473 = vmatmul.mubr.msk.f32.gmra.mrb[72].mxu0 %vm550_vm2, %v3741_v60 }
 0x45d   :  { %2642 = vmatmul.mubr.msk.f32.gmra.mrb[88].mxu1 %vm550_vm2, %v3626_v45  ;;  %1950 = vmatprep.mubr.f32.mxu0 %v2850_v15  ;;  %v3980_v8 = vpop.permute.xlu1 %1254 }
 0x45e   :  { %2644 = vmatprep.mubr.msk.f32.mxu1 %vm550_vm2, %v3632_v48 }
 0x460   :  { %2474 = vmatmul.mubr.msk.f32.gmra.mrb[74].mxu0 %vm550_vm2, %v3750_v9 }
 0x461   :  { %2645 = vmatmul.mubr.msk.f32.gmra.mrb[90].mxu1 %vm550_vm2, %v3663_v43  ;;  %1956 = vmatprep.mubr.f32.mxu0 %v2850_v15  ;;  %v3988_v43 = vpop.permute.xlu1 %1264 }
 0x462   :  { %2647 = vmatprep.mubr.msk.f32.mxu1 %vm550_vm2, %v3675_v38 }
 0x464   :  { %2475 = vmatmul.mubr.msk.f32.gmra.mrb[76].mxu0 %vm550_vm2, %v3759_v22 }
 0x465   :  { %2648 = vmatmul.mubr.msk.f32.gmra.mrb[92].mxu1 %vm550_vm2, %v3684_v32  ;;  %1962 = vmatprep.mubr.f32.mxu0 %v2850_v15 }
 0x466   :  { %2650 = vmatprep.mubr.msk.f32.mxu1 %vm550_vm2, %v3693_v17 }
 0x468   :  { %2476 = vmatmul.mubr.msk.f32.gmra.mrb[78].mxu0 %vm550_vm2, %v3768_v56 }
 0x469   :  { %2651 = vmatmul.mubr.msk.f32.gmra.mrb[94].mxu1 %vm550_vm2, %v3704_v21  ;;  %1968 = vmatprep.mubr.f32.mxu0 %v2850_v15 }
 0x46a   :  { %2653 = vmatprep.mubr.msk.f32.mxu1 %vm550_vm2, %v3714_v51 }
 0x46c   :  { %2477 = vmatmul.mubr.msk.f32.gmra.mrb[80].mxu0 %vm550_vm2, %v3777_v27 }
 0x46d   :  { %2654 = vmatmul.mubr.msk.f32.gmra.mrb[96].mxu1 %vm550_vm2, %v3723_v18  ;;  %1974 = vmatprep.mubr.f32.mxu0 %v2850_v15 }
 0x46e   :  { %2656 = vmatprep.mubr.msk.f32.mxu1 %vm550_vm2, %v3732_v20 }
 0x470   :  { %2478 = vmatmul.mubr.msk.f32.gmra.mrb[82].mxu0 %vm550_vm2, %v3786_v33 }
 0x471   :  { %2657 = vmatmul.mubr.msk.f32.gmra.mrb[98].mxu1 %vm550_vm2, %v3741_v60  ;;  %1980 = vmatprep.mubr.f32.mxu0 %v2850_v15 }
 0x472   :  { %2659 = vmatprep.mubr.msk.f32.mxu1 %vm550_vm2, %v3750_v9 }
 0x474   :  { %2479 = vmatmul.mubr.msk.f32.gmra.mrb[84].mxu0 %vm550_vm2, %v3638_v11 }
 0x475   :  { %2660 = vmatmul.mubr.msk.f32.gmra.mrb[100].mxu1 %vm550_vm2, %v3759_v22  ;;  %1986 = vmatprep.mubr.f32.mxu0 %v2850_v15 }
 0x476   :  { %2662 = vmatprep.mubr.msk.f32.mxu1 %vm550_vm2, %v3768_v56 }
 0x478   :  { %2480 = vmatmul.mubr.msk.f32.gmra.mrb[86].mxu0 %vm550_vm2, %v3646_v13 }
 0x479   :  { %2663 = vmatmul.mubr.msk.f32.gmra.mrb[102].mxu1 %vm550_vm2, %v3777_v27  ;;  %1992 = vmatprep.mubr.f32.mxu0 %v2850_v15 }
 0x47a   :  { %2665 = vmatprep.mubr.msk.f32.mxu1 %vm550_vm2, %v3786_v33 }
 0x47c   :  { %2481 = vmatmul.mubr.msk.f32.gmra.mrb[88].mxu0 %vm550_vm2, %v3654_v39 }
 0x47d   :  { %2666 = vmatmul.mubr.msk.f32.gmra.mrb[104].mxu1 %vm550_vm2, %v3638_v11  ;;  %1998 = vmatprep.mubr.f32.mxu0 %v2850_v15 }
 0x47e   :  { %2668 = vmatprep.mubr.msk.f32.mxu1 %vm550_vm2, %v3646_v13 }
 0x480   :  { %2482 = vmatmul.mubr.msk.f32.gmra.mrb[90].mxu0 %vm550_vm2, %v3659_v30 }
 0x481   :  { %2669 = vmatmul.mubr.msk.f32.gmra.mrb[106].mxu1 %vm550_vm2, %v3654_v39  ;;  %2004 = vmatprep.mubr.f32.mxu0 %v2850_v15 }
 0x482   :  { %2671 = vmatprep.mubr.msk.f32.mxu1 %vm550_vm2, %v3659_v30  ;;  %v3985_v30 = vpop.permute.xlu0 %1269 }
 0x484   :  { %2483 = vmatmul.mubr.msk.f32.gmra.mrb[92].mxu0 %vm550_vm2, %v3670_v25 }
 0x485   :  { %2672 = vmatmul.mubr.msk.f32.gmra.mrb[108].mxu1 %vm550_vm2, %v3670_v25  ;;  %v3992_v25 = vpop.permute.xlu1 %1274 }
 0x486   :  { %v3990_v37 = vpop.permute.xlu0 %1279 }
 0x489   :  { %v3996_v38 = vpop.permute.xlu1 %1284 }
 0x48a   :  { %v3994_v41 = vpop.permute.xlu0 %1289 }
 0x48d   :  { %v4000_v10 = vpop.permute.xlu1 %1294 }
 0x48e   :  { %v4004_v18 = vpop.permute.xlu0 %1299 }
 0x491   :  { %v4008_v55 = vpop.permute.xlu1 %1304 }
 0x492   :  { %v4014_v33 = vpop.permute.xlu0 %1309 }
 0x493   :  { %v1450_v52 = vpop.f32.mrb[8].mxu0 }
 0x494   :  { %v1451_v15 = vadd.f32 %v1450_v52, %v3939_v29  ;;  %v1452_v61 = vpop.f32.mrb[9].mxu0 }
 0x495   :  { %v1453_v53 = vadd.f32 %v1452_v61, %v3939_v29 }
 0x496   :  { %2196 = vst [vmem:[#allocation2] sm:$0xff] %v1451_v15 }
 0x497   :  { %2197 = vst [vmem:[#allocation2 + $0x8] sm:$0xff] %v1453_v53  ;;  %v1456_v36 = vpop.f32.mrb[10].mxu0 }
 0x498   :  { %v1457_v57 = vadd.f32 %v1456_v36, %v3937_v28  ;;  %v1458_v59 = vpop.f32.mrb[11].mxu0 }
 0x499   :  { %v1459_v0 = vadd.f32 %v1458_v59, %v3937_v28 }
 0x49a   :  { %2203 = vst [vmem:[#allocation2 + $0x38] sm:$0xff] %v1457_v57 }
 0x49b   :  { %2204 = vst [vmem:[#allocation2 + $0x40] sm:$0xff] %v1459_v0 }
 0x49f   :  { %v1462_v23 = vpop.f32.mrb[12].mxu0 }
 0x4a0   :  { %v1463_v4 = vadd.f32 %v1462_v23, %v3954_v62  ;;  %v1464_v5 = vpop.f32.mrb[13].mxu0 }
 0x4a1   :  { %v1465_v45 = vadd.f32 %v1464_v5, %v3954_v62 }
 0x4a2   :  { %2210 = vst [vmem:[#allocation2 + $0x70] sm:$0xff] %v1463_v4 }
 0x4a3   :  { %2211 = vst [vmem:[#allocation2 + $0x78] sm:$0xff] %v1465_v45  ;;  %v1468_v48 = vpop.f32.mrb[14].mxu0 }
 0x4a4   :  { %v1469_v11 = vadd.f32 %v1468_v48, %v3948_v19  ;;  %v1470_v12 = vpop.f32.mrb[15].mxu0 }
 0x4a5   :  { %v1471_v13 = vadd.f32 %v1470_v12, %v3948_v19 }
 0x4a6   :  { %2217 = vst [vmem:[#allocation2 + $0xa8] sm:$0xff] %v1469_v11 }
 0x4a7   :  { %2218 = vst [vmem:[#allocation2 + $0xb0] sm:$0xff] %v1471_v13  ;;  %v1474_v26 = vpop.f32.mrb[16].mxu0 }
 0x4a8   :  { %v1475_v39 = vadd.f32 %v1474_v26, %v3958_v7  ;;  %v1476_v42 = vpop.f32.mrb[17].mxu0 }
 0x4a9   :  { %v1477_v6 = vadd.f32 %v1476_v42, %v3958_v7 }
 0x4aa   :  { %2224 = vst [vmem:[#allocation2 + $0xe0] sm:$0xff] %v1475_v39 }
 0x4ab   :  { %2225 = vst [vmem:[#allocation2 + $0xe8] sm:$0xff] %v1477_v6 }
 0x4b6   :  { %v1564_v16 = vpop.f32.mrb[28].mxu1 }
 0x4b7   :  { %v1565_v32 = vadd.f32 %v1564_v16, %v3994_v41  ;;  %v1566_v14 = vpop.f32.mrb[29].mxu1 }
 0x4b8   :  { %v1567_v17 = vadd.f32 %v1566_v14, %v3994_v41 }
 0x4b9   :  { %2329 = vst [vmem:[#allocation2 + $0x428] sm:$0xff] %v1565_v32 }
 0x4ba   :  { %2330 = vst [vmem:[#allocation2 + $0x430] sm:$0xff] %v1567_v17 }
 0x4bc   :  { %v1570_v21 = vpop.f32.mrb[30].mxu1 }
 0x4bd   :  { %v1571_v24 = vadd.f32 %v1570_v21, %v4000_v10  ;;  %v1572_v51 = vpop.f32.mrb[31].mxu1 }
 0x4be   :  { %v1573_v40 = vadd.f32 %v1572_v51, %v4000_v10 }
 0x4bf   :  { %2336 = vst [vmem:[#allocation2 + $0x460] sm:$0xff] %v1571_v24 }
 0x4c0   :  { %2337 = vst [vmem:[#allocation2 + $0x468] sm:$0xff] %v1573_v40  ;;  %v1576_v44 = vpop.f32.mrb[32].mxu1 }
 0x4c1   :  { %v1577_v20 = vadd.f32 %v1576_v44, %v4004_v18  ;;  %v1578_v34 = vpop.f32.mrb[33].mxu1 }
 0x4c2   :  { %v1579_v60 = vadd.f32 %v1578_v34, %v4004_v18 }
 0x4c3   :  { %2343 = vst [vmem:[#allocation2 + $0x498] sm:$0xff] %v1577_v20  ;;  %v1480_v9 = vpop.f32.mrb[18].mxu0 }
 0x4c4   :  { %2344 = vst [vmem:[#allocation2 + $0x4a0] sm:$0xff] %v1579_v60  ;;  %v1582_v31 = vpop.f32.mrb[34].mxu1  ;;  %v1481_v22 = vadd.f32 %v1480_v9, %v3956_v50  ;;  %v1482_v56 = vpop.f32.mrb[19].mxu0 }
 0x4c5   :  { %v1583_v63 = vadd.f32 %v1582_v31, %v4008_v55  ;;  %v1584_v35 = vpop.f32.mrb[35].mxu1  ;;  %v1483_v27 = vadd.f32 %v1482_v56, %v3956_v50 }
 0x4c6   :  { %v1585_v3 = vadd.f32 %v1584_v35, %v4008_v55  ;;  %2231 = vst [vmem:[#allocation2 + $0x118] sm:$0xff] %v1481_v22 }
 0x4c7   :  { %2350 = vst [vmem:[#allocation2 + $0x4d0] sm:$0xff] %v1583_v63  ;;  %2232 = vst [vmem:[#allocation2 + $0x120] sm:$0xff] %v1483_v27  ;;  %v1486_v52 = vpop.f32.mrb[20].mxu0 }
 0x4c8   :  { %2351 = vst [vmem:[#allocation2 + $0x4d8] sm:$0xff] %v1585_v3  ;;  %v1588_v15 = vpop.f32.mrb[36].mxu1  ;;  %v1487_v61 = vadd.f32 %v1486_v52, %v3962_v49  ;;  %v1488_v36 = vpop.f32.mrb[21].mxu0 }
 0x4c9   :  { %v1589_v53 = vadd.f32 %v1588_v15, %v4014_v33  ;;  %v1590_v57 = vpop.f32.mrb[37].mxu1  ;;  %v1489_v59 = vadd.f32 %v1488_v36, %v3962_v49 }
 0x4ca   :  { %v1591_v0 = vadd.f32 %v1590_v57, %v4014_v33  ;;  %2238 = vst [vmem:[#allocation2 + $0x150] sm:$0xff] %v1487_v61 }
 0x4cb   :  { %2357 = vst [vmem:[#allocation2 + $0x508] sm:$0xff] %v1589_v53  ;;  %2239 = vst [vmem:[#allocation2 + $0x158] sm:$0xff] %v1489_v59  ;;  %v1492_v23 = vpop.f32.mrb[22].mxu0 }
 0x4cc   :  { %2358 = vst [vmem:[#allocation2 + $0x510] sm:$0xff] %v1591_v0  ;;  %v1659_v4 = vpop.f32.mrb[38].mxu1  ;;  %v1493_v5 = vadd.f32 %v1492_v23, %v3960_v47  ;;  %v1494_v48 = vpop.f32.mrb[23].mxu0 }
 0x4cd   :  { %v1660_v45 = vadd.f32 %v1659_v4, %v3939_v29  ;;  %v1661_v11 = vpop.f32.mrb[39].mxu1  ;;  %v1495_v12 = vadd.f32 %v1494_v48, %v3960_v47 }
 0x4ce   :  { %v1662_v13 = vadd.f32 %v1661_v11, %v3939_v29  ;;  %2245 = vst [vmem:[#allocation2 + $0x188] sm:$0xff] %v1493_v5 }
 0x4cf   :  { %2198 = vst [vmem:[#allocation2 + $0x10] sm:$0xff] %v1660_v45  ;;  %2246 = vst [vmem:[#allocation2 + $0x190] sm:$0xff] %v1495_v12  ;;  %v1498_v26 = vpop.f32.mrb[24].mxu0 }
 0x4d0   :  { %2199 = vst [vmem:[#allocation2 + $0x18] sm:$0xff] %v1662_v13  ;;  %v1665_v39 = vpop.f32.mrb[40].mxu1  ;;  %v1499_v42 = vadd.f32 %v1498_v26, %v3968_v58  ;;  %v1500_v16 = vpop.f32.mrb[25].mxu0 }
 0x4d1   :  { %v1666_v6 = vadd.f32 %v1665_v39, %v3937_v28  ;;  %v1667_v32 = vpop.f32.mrb[41].mxu1  ;;  %v1501_v14 = vadd.f32 %v1500_v16, %v3968_v58 }
 0x4d2   :  { %v1668_v17 = vadd.f32 %v1667_v32, %v3937_v28  ;;  %2252 = vst [vmem:[#allocation2 + $0x1c0] sm:$0xff] %v1499_v42 }
 0x4d3   :  { %2205 = vst [vmem:[#allocation2 + $0x48] sm:$0xff] %v1666_v6  ;;  %2253 = vst [vmem:[#allocation2 + $0x1c8] sm:$0xff] %v1501_v14  ;;  %v1504_v21 = vpop.f32.mrb[26].mxu0 }
 0x4d4   :  { %2206 = vst [vmem:[#allocation2 + $0x50] sm:$0xff] %v1668_v17  ;;  %v1671_v24 = vpop.f32.mrb[42].mxu1  ;;  %v1505_v51 = vadd.f32 %v1504_v21, %v3966_v54  ;;  %v1506_v44 = vpop.f32.mrb[27].mxu0 }
 0x4d5   :  { %v1672_v40 = vadd.f32 %v1671_v24, %v3954_v62  ;;  %v1673_v20 = vpop.f32.mrb[43].mxu1  ;;  %v1507_v34 = vadd.f32 %v1506_v44, %v3966_v54 }
 0x4d6   :  { %v1674_v60 = vadd.f32 %v1673_v20, %v3954_v62  ;;  %2259 = vst [vmem:[#allocation2 + $0x1f8] sm:$0xff] %v1505_v51 }
 0x4d7   :  { %2212 = vst [vmem:[#allocation2 + $0x80] sm:$0xff] %v1672_v40  ;;  %2260 = vst [vmem:[#allocation2 + $0x200] sm:$0xff] %v1507_v34  ;;  %v1510_v9 = vpop.f32.mrb[28].mxu0 }
 0x4d8   :  { %2213 = vst [vmem:[#allocation2 + $0x88] sm:$0xff] %v1674_v60  ;;  %v1677_v31 = vpop.f32.mrb[44].mxu1  ;;  %v1511_v22 = vadd.f32 %v1510_v9, %v3974_v2  ;;  %v1512_v56 = vpop.f32.mrb[29].mxu0 }
 0x4d9   :  { %v1678_v63 = vadd.f32 %v1677_v31, %v3948_v19  ;;  %v1679_v35 = vpop.f32.mrb[45].mxu1  ;;  %v1513_v27 = vadd.f32 %v1512_v56, %v3974_v2 }
 0x4da   :  { %v1680_v3 = vadd.f32 %v1679_v35, %v3948_v19  ;;  %2266 = vst [vmem:[#allocation2 + $0x230] sm:$0xff] %v1511_v22 }
 0x4db   :  { %2219 = vst [vmem:[#allocation2 + $0xb8] sm:$0xff] %v1678_v63  ;;  %2267 = vst [vmem:[#allocation2 + $0x238] sm:$0xff] %v1513_v27  ;;  %v1516_v52 = vpop.f32.mrb[30].mxu0 }
 0x4dc   :  { %2220 = vst [vmem:[#allocation2 + $0xc0] sm:$0xff] %v1680_v3  ;;  %v1683_v15 = vpop.f32.mrb[46].mxu1  ;;  %v1517_v61 = vadd.f32 %v1516_v52, %v3972_v1  ;;  %v1518_v36 = vpop.f32.mrb[31].mxu0 }
 0x4dd   :  { %v1684_v53 = vadd.f32 %v1683_v15, %v3958_v7  ;;  %v1685_v57 = vpop.f32.mrb[47].mxu1  ;;  %v1519_v59 = vadd.f32 %v1518_v36, %v3972_v1 }
 0x4de   :  { %v1686_v0 = vadd.f32 %v1685_v57, %v3958_v7  ;;  %2273 = vst [vmem:[#allocation2 + $0x268] sm:$0xff] %v1517_v61 }
 0x4df   :  { %2226 = vst [vmem:[#allocation2 + $0xf0] sm:$0xff] %v1684_v53  ;;  %2274 = vst [vmem:[#allocation2 + $0x270] sm:$0xff] %v1519_v59  ;;  %v1522_v23 = vpop.f32.mrb[32].mxu0 }
 0x4e0   :  { %2227 = vst [vmem:[#allocation2 + $0xf8] sm:$0xff] %v1686_v0  ;;  %v1689_v4 = vpop.f32.mrb[48].mxu1  ;;  %v1523_v5 = vadd.f32 %v1522_v23, %v3980_v8  ;;  %v1524_v48 = vpop.f32.mrb[33].mxu0 }
 0x4e1   :  { %v1690_v45 = vadd.f32 %v1689_v4, %v3956_v50  ;;  %v1691_v11 = vpop.f32.mrb[49].mxu1  ;;  %v1525_v12 = vadd.f32 %v1524_v48, %v3980_v8 }
 0x4e2   :  { %v1692_v13 = vadd.f32 %v1691_v11, %v3956_v50  ;;  %2280 = vst [vmem:[#allocation2 + $0x2a0] sm:$0xff] %v1523_v5 }
 0x4e3   :  { %2233 = vst [vmem:[#allocation2 + $0x128] sm:$0xff] %v1690_v45  ;;  %2281 = vst [vmem:[#allocation2 + $0x2a8] sm:$0xff] %v1525_v12  ;;  %v1528_v26 = vpop.f32.mrb[34].mxu0 }
 0x4e4   :  { %2234 = vst [vmem:[#allocation2 + $0x130] sm:$0xff] %v1692_v13  ;;  %v1695_v39 = vpop.f32.mrb[50].mxu1  ;;  %v1529_v42 = vadd.f32 %v1528_v26, %v3978_v46  ;;  %v1530_v16 = vpop.f32.mrb[35].mxu0 }
 0x4e5   :  { %v1696_v6 = vadd.f32 %v1695_v39, %v3962_v49  ;;  %v1697_v32 = vpop.f32.mrb[51].mxu1  ;;  %v1531_v14 = vadd.f32 %v1530_v16, %v3978_v46 }
 0x4e6   :  { %v1698_v17 = vadd.f32 %v1697_v32, %v3962_v49  ;;  %2287 = vst [vmem:[#allocation2 + $0x2d8] sm:$0xff] %v1529_v42 }
 0x4e7   :  { %2240 = vst [vmem:[#allocation2 + $0x160] sm:$0xff] %v1696_v6  ;;  %2288 = vst [vmem:[#allocation2 + $0x2e0] sm:$0xff] %v1531_v14  ;;  %v1534_v21 = vpop.f32.mrb[36].mxu0 }
 0x4e8   :  { %2241 = vst [vmem:[#allocation2 + $0x168] sm:$0xff] %v1698_v17  ;;  %v1701_v24 = vpop.f32.mrb[52].mxu1  ;;  %v1535_v51 = vadd.f32 %v1534_v21, %v3988_v43  ;;  %v1536_v44 = vpop.f32.mrb[37].mxu0 }
 0x4e9   :  { %v1702_v40 = vadd.f32 %v1701_v24, %v3960_v47  ;;  %v1703_v20 = vpop.f32.mrb[53].mxu1  ;;  %v1537_v34 = vadd.f32 %v1536_v44, %v3988_v43 }
 0x4ea   :  { %v1704_v60 = vadd.f32 %v1703_v20, %v3960_v47  ;;  %2294 = vst [vmem:[#allocation2 + $0x310] sm:$0xff] %v1535_v51 }
 0x4eb   :  { %2247 = vst [vmem:[#allocation2 + $0x198] sm:$0xff] %v1702_v40  ;;  %2295 = vst [vmem:[#allocation2 + $0x318] sm:$0xff] %v1537_v34  ;;  %v1540_v9 = vpop.f32.mrb[38].mxu0 }
 0x4ec   :  { %2248 = vst [vmem:[#allocation2 + $0x1a0] sm:$0xff] %v1704_v60  ;;  %v1707_v31 = vpop.f32.mrb[54].mxu1  ;;  %v1541_v22 = vadd.f32 %v1540_v9, %v3985_v30  ;;  %v1542_v56 = vpop.f32.mrb[39].mxu0 }
 0x4ed   :  { %v1708_v63 = vadd.f32 %v1707_v31, %v3968_v58  ;;  %v1709_v35 = vpop.f32.mrb[55].mxu1  ;;  %v1543_v27 = vadd.f32 %v1542_v56, %v3985_v30 }
 0x4ee   :  { %v1710_v3 = vadd.f32 %v1709_v35, %v3968_v58  ;;  %2301 = vst [vmem:[#allocation2 + $0x348] sm:$0xff] %v1541_v22 }
 0x4ef   :  { %2254 = vst [vmem:[#allocation2 + $0x1d0] sm:$0xff] %v1708_v63  ;;  %2302 = vst [vmem:[#allocation2 + $0x350] sm:$0xff] %v1543_v27  ;;  %v1546_v52 = vpop.f32.mrb[40].mxu0 }
 0x4f0   :  { %2255 = vst [vmem:[#allocation2 + $0x1d8] sm:$0xff] %v1710_v3  ;;  %v1713_v15 = vpop.f32.mrb[56].mxu1  ;;  %v1547_v61 = vadd.f32 %v1546_v52, %v3992_v25  ;;  %v1548_v36 = vpop.f32.mrb[41].mxu0 }
 0x4f1   :  { %v1714_v53 = vadd.f32 %v1713_v15, %v3966_v54  ;;  %v1715_v57 = vpop.f32.mrb[57].mxu1  ;;  %v1549_v59 = vadd.f32 %v1548_v36, %v3992_v25 }
 0x4f2   :  { %v1716_v0 = vadd.f32 %v1715_v57, %v3966_v54  ;;  %2308 = vst [vmem:[#allocation2 + $0x380] sm:$0xff] %v1547_v61 }
 0x4f3   :  { %2261 = vst [vmem:[#allocation2 + $0x208] sm:$0xff] %v1714_v53  ;;  %2309 = vst [vmem:[#allocation2 + $0x388] sm:$0xff] %v1549_v59  ;;  %v1552_v23 = vpop.f32.mrb[42].mxu0 }
 0x4f4   :  { %2262 = vst [vmem:[#allocation2 + $0x210] sm:$0xff] %v1716_v0  ;;  %v1719_v4 = vpop.f32.mrb[58].mxu1  ;;  %v1553_v5 = vadd.f32 %v1552_v23, %v3990_v37  ;;  %v1554_v48 = vpop.f32.mrb[43].mxu0 }
 0x4f5   :  { %v1720_v45 = vadd.f32 %v1719_v4, %v3974_v2  ;;  %v1721_v11 = vpop.f32.mrb[59].mxu1  ;;  %v1555_v12 = vadd.f32 %v1554_v48, %v3990_v37 }
 0x4f6   :  { %v1722_v13 = vadd.f32 %v1721_v11, %v3974_v2  ;;  %2315 = vst [vmem:[#allocation2 + $0x3b8] sm:$0xff] %v1553_v5 }
 0x4f7   :  { %2268 = vst [vmem:[#allocation2 + $0x240] sm:$0xff] %v1720_v45  ;;  %2316 = vst [vmem:[#allocation2 + $0x3c0] sm:$0xff] %v1555_v12  ;;  %v1558_v26 = vpop.f32.mrb[44].mxu0 }
 0x4f8   :  { %2269 = vst [vmem:[#allocation2 + $0x248] sm:$0xff] %v1722_v13  ;;  %v1725_v39 = vpop.f32.mrb[60].mxu1  ;;  %v1559_v42 = vadd.f32 %v1558_v26, %v3996_v38  ;;  %v1560_v16 = vpop.f32.mrb[45].mxu0 }
 0x4f9   :  { %v1726_v6 = vadd.f32 %v1725_v39, %v3972_v1  ;;  %v1727_v32 = vpop.f32.mrb[61].mxu1  ;;  %v1561_v14 = vadd.f32 %v1560_v16, %v3996_v38 }
 0x4fa   :  { %v1728_v17 = vadd.f32 %v1727_v32, %v3972_v1  ;;  %2322 = vst [vmem:[#allocation2 + $0x3f0] sm:$0xff] %v1559_v42 }
 0x4fb   :  { %2275 = vst [vmem:[#allocation2 + $0x278] sm:$0xff] %v1726_v6  ;;  %2323 = vst [vmem:[#allocation2 + $0x3f8] sm:$0xff] %v1561_v14  ;;  %v1868_v24 = vpop.f32.mrb[46].mxu0 }
 0x4fc   :  { %2276 = vst [vmem:[#allocation2 + $0x280] sm:$0xff] %v1728_v17  ;;  %v1731_v21 = vpop.f32.mrb[62].mxu1  ;;  %v1869_v40 = vadd.f32 %v1868_v24, %v3939_v29  ;;  %v1870_v20 = vpop.f32.mrb[47].mxu0 }
 0x4fd   :  { %v1732_v51 = vadd.f32 %v1731_v21, %v3980_v8  ;;  %v1733_v44 = vpop.f32.mrb[63].mxu1  ;;  %v1871_v60 = vadd.f32 %v1870_v20, %v3939_v29 }
 0x4fe   :  { %v1734_v34 = vadd.f32 %v1733_v44, %v3980_v8  ;;  %2200 = vst [vmem:[#allocation2 + $0x20] sm:$0xff] %v1869_v40 }
 0x4ff   :  { %2282 = vst [vmem:[#allocation2 + $0x2b0] sm:$0xff] %v1732_v51  ;;  %2201 = vst [vmem:[#allocation2 + $0x28] sm:$0xff] %v1871_v60  ;;  %v1874_v31 = vpop.f32.mrb[48].mxu0 }
 0x500   :  { %2283 = vst [vmem:[#allocation2 + $0x2b8] sm:$0xff] %v1734_v34  ;;  %v1737_v9 = vpop.f32.mrb[64].mxu1  ;;  %v1875_v63 = vadd.f32 %v1874_v31, %v3937_v28  ;;  %v1876_v35 = vpop.f32.mrb[49].mxu0 }
 0x501   :  { %v1738_v22 = vadd.f32 %v1737_v9, %v3978_v46  ;;  %v1739_v56 = vpop.f32.mrb[65].mxu1  ;;  %v1877_v3 = vadd.f32 %v1876_v35, %v3937_v28 }
 0x502   :  { %v1740_v27 = vadd.f32 %v1739_v56, %v3978_v46  ;;  %2207 = vst [vmem:[#allocation2 + $0x58] sm:$0xff] %v1875_v63 }
 0x503   :  { %2289 = vst [vmem:[#allocation2 + $0x2e8] sm:$0xff] %v1738_v22  ;;  %2208 = vst [vmem:[#allocation2 + $0x60] sm:$0xff] %v1877_v3  ;;  %v1880_v15 = vpop.f32.mrb[50].mxu0 }
 0x504   :  { %2290 = vst [vmem:[#allocation2 + $0x2f0] sm:$0xff] %v1740_v27  ;;  %v1743_v52 = vpop.f32.mrb[66].mxu1  ;;  %v1881_v53 = vadd.f32 %v1880_v15, %v3954_v62  ;;  %v1882_v57 = vpop.f32.mrb[51].mxu0 }
 0x505   :  { %v1744_v61 = vadd.f32 %v1743_v52, %v3988_v43  ;;  %v1745_v36 = vpop.f32.mrb[67].mxu1  ;;  %v1883_v0 = vadd.f32 %v1882_v57, %v3954_v62 }
 0x506   :  { %v1746_v59 = vadd.f32 %v1745_v36, %v3988_v43  ;;  %2214 = vst [vmem:[#allocation2 + $0x90] sm:$0xff] %v1881_v53 }
 0x507   :  { %2296 = vst [vmem:[#allocation2 + $0x320] sm:$0xff] %v1744_v61  ;;  %2215 = vst [vmem:[#allocation2 + $0x98] sm:$0xff] %v1883_v0  ;;  %v1886_v4 = vpop.f32.mrb[52].mxu0 }
 0x508   :  { %2297 = vst [vmem:[#allocation2 + $0x328] sm:$0xff] %v1746_v59  ;;  %v1749_v23 = vpop.f32.mrb[68].mxu1  ;;  %v1887_v45 = vadd.f32 %v1886_v4, %v3948_v19  ;;  %v1888_v11 = vpop.f32.mrb[53].mxu0 }
 0x509   :  { %v1750_v5 = vadd.f32 %v1749_v23, %v3985_v30  ;;  %v1751_v48 = vpop.f32.mrb[69].mxu1  ;;  %v1889_v13 = vadd.f32 %v1888_v11, %v3948_v19 }
 0x50a   :  { %v1752_v12 = vadd.f32 %v1751_v48, %v3985_v30  ;;  %2221 = vst [vmem:[#allocation2 + $0xc8] sm:$0xff] %v1887_v45 }
 0x50b   :  { %2303 = vst [vmem:[#allocation2 + $0x358] sm:$0xff] %v1750_v5  ;;  %2222 = vst [vmem:[#allocation2 + $0xd0] sm:$0xff] %v1889_v13  ;;  %v1892_v39 = vpop.f32.mrb[54].mxu0 }
 0x50c   :  { %2304 = vst [vmem:[#allocation2 + $0x360] sm:$0xff] %v1752_v12  ;;  %v1755_v26 = vpop.f32.mrb[70].mxu1  ;;  %v1893_v6 = vadd.f32 %v1892_v39, %v3958_v7  ;;  %v1894_v32 = vpop.f32.mrb[55].mxu0 }
 0x50d   :  { %v1756_v42 = vadd.f32 %v1755_v26, %v3992_v25  ;;  %v1757_v16 = vpop.f32.mrb[71].mxu1  ;;  %v1895_v17 = vadd.f32 %v1894_v32, %v3958_v7 }
 0x50e   :  { %v1758_v14 = vadd.f32 %v1757_v16, %v3992_v25  ;;  %2228 = vst [vmem:[#allocation2 + $0x100] sm:$0xff] %v1893_v6 }
 0x50f   :  { %2310 = vst [vmem:[#allocation2 + $0x390] sm:$0xff] %v1756_v42  ;;  %2229 = vst [vmem:[#allocation2 + $0x108] sm:$0xff] %v1895_v17  ;;  %v1898_v24 = vpop.f32.mrb[56].mxu0 }
 0x510   :  { %2311 = vst [vmem:[#allocation2 + $0x398] sm:$0xff] %v1758_v14  ;;  %v1761_v21 = vpop.f32.mrb[72].mxu1  ;;  %v1899_v40 = vadd.f32 %v1898_v24, %v3956_v50  ;;  %v1900_v20 = vpop.f32.mrb[57].mxu0 }
 0x511   :  { %v1762_v51 = vadd.f32 %v1761_v21, %v3990_v37  ;;  %v1763_v44 = vpop.f32.mrb[73].mxu1  ;;  %v1901_v60 = vadd.f32 %v1900_v20, %v3956_v50 }
 0x512   :  { %v1764_v34 = vadd.f32 %v1763_v44, %v3990_v37  ;;  %2235 = vst [vmem:[#allocation2 + $0x138] sm:$0xff] %v1899_v40 }
 0x513   :  { %2317 = vst [vmem:[#allocation2 + $0x3c8] sm:$0xff] %v1762_v51  ;;  %2236 = vst [vmem:[#allocation2 + $0x140] sm:$0xff] %v1901_v60  ;;  %v1904_v31 = vpop.f32.mrb[58].mxu0 }
 0x514   :  { %2318 = vst [vmem:[#allocation2 + $0x3d0] sm:$0xff] %v1764_v34  ;;  %v1767_v9 = vpop.f32.mrb[74].mxu1  ;;  %v1905_v63 = vadd.f32 %v1904_v31, %v3962_v49  ;;  %v1906_v35 = vpop.f32.mrb[59].mxu0 }
 0x515   :  { %v1768_v22 = vadd.f32 %v1767_v9, %v3996_v38  ;;  %v1769_v56 = vpop.f32.mrb[75].mxu1  ;;  %v1907_v3 = vadd.f32 %v1906_v35, %v3962_v49 }
 0x516   :  { %v1770_v27 = vadd.f32 %v1769_v56, %v3996_v38  ;;  %2242 = vst [vmem:[#allocation2 + $0x170] sm:$0xff] %v1905_v63 }
 0x517   :  { %2324 = vst [vmem:[#allocation2 + $0x400] sm:$0xff] %v1768_v22  ;;  %2243 = vst [vmem:[#allocation2 + $0x178] sm:$0xff] %v1907_v3  ;;  %v1910_v15 = vpop.f32.mrb[60].mxu0 }
 0x518   :  { %2325 = vst [vmem:[#allocation2 + $0x408] sm:$0xff] %v1770_v27  ;;  %v1773_v52 = vpop.f32.mrb[76].mxu1  ;;  %v1911_v53 = vadd.f32 %v1910_v15, %v3960_v47  ;;  %v1912_v57 = vpop.f32.mrb[61].mxu0 }
 0x519   :  { %v1774_v61 = vadd.f32 %v1773_v52, %v3994_v41  ;;  %v1775_v36 = vpop.f32.mrb[77].mxu1  ;;  %v1913_v0 = vadd.f32 %v1912_v57, %v3960_v47 }
 0x51a   :  { %v1776_v59 = vadd.f32 %v1775_v36, %v3994_v41  ;;  %2249 = vst [vmem:[#allocation2 + $0x1a8] sm:$0xff] %v1911_v53 }
 0x51b   :  { %2331 = vst [vmem:[#allocation2 + $0x438] sm:$0xff] %v1774_v61  ;;  %2250 = vst [vmem:[#allocation2 + $0x1b0] sm:$0xff] %v1913_v0  ;;  %v1916_v4 = vpop.f32.mrb[62].mxu0 }
 0x51c   :  { %2332 = vst [vmem:[#allocation2 + $0x440] sm:$0xff] %v1776_v59  ;;  %v1779_v23 = vpop.f32.mrb[78].mxu1  ;;  %v1917_v45 = vadd.f32 %v1916_v4, %v3968_v58  ;;  %v1918_v11 = vpop.f32.mrb[63].mxu0 }
 0x51d   :  { %v1780_v5 = vadd.f32 %v1779_v23, %v4000_v10  ;;  %v1781_v48 = vpop.f32.mrb[79].mxu1  ;;  %v1919_v13 = vadd.f32 %v1918_v11, %v3968_v58 }
 0x51e   :  { %v1782_v12 = vadd.f32 %v1781_v48, %v4000_v10  ;;  %2256 = vst [vmem:[#allocation2 + $0x1e0] sm:$0xff] %v1917_v45 }
 0x51f   :  { %2338 = vst [vmem:[#allocation2 + $0x470] sm:$0xff] %v1780_v5  ;;  %2257 = vst [vmem:[#allocation2 + $0x1e8] sm:$0xff] %v1919_v13  ;;  %v1922_v39 = vpop.f32.mrb[64].mxu0 }
 0x520   :  { %2339 = vst [vmem:[#allocation2 + $0x478] sm:$0xff] %v1782_v12  ;;  %v1785_v26 = vpop.f32.mrb[80].mxu1  ;;  %v1923_v6 = vadd.f32 %v1922_v39, %v3966_v54  ;;  %v1924_v32 = vpop.f32.mrb[65].mxu0 }
 0x521   :  { %v1786_v42 = vadd.f32 %v1785_v26, %v4004_v18  ;;  %v1787_v16 = vpop.f32.mrb[81].mxu1  ;;  %v1925_v17 = vadd.f32 %v1924_v32, %v3966_v54 }
 0x522   :  { %v1788_v14 = vadd.f32 %v1787_v16, %v4004_v18  ;;  %2263 = vst [vmem:[#allocation2 + $0x218] sm:$0xff] %v1923_v6 }
 0x523   :  { %2345 = vst [vmem:[#allocation2 + $0x4a8] sm:$0xff] %v1786_v42  ;;  %2264 = vst [vmem:[#allocation2 + $0x220] sm:$0xff] %v1925_v17  ;;  %v1928_v24 = vpop.f32.mrb[66].mxu0 }
 0x524   :  { %2346 = vst [vmem:[#allocation2 + $0x4b0] sm:$0xff] %v1788_v14  ;;  %v1791_v21 = vpop.f32.mrb[82].mxu1  ;;  %v1929_v40 = vadd.f32 %v1928_v24, %v3974_v2  ;;  %v1930_v20 = vpop.f32.mrb[67].mxu0 }
 0x525   :  { %v1792_v51 = vadd.f32 %v1791_v21, %v4008_v55  ;;  %v1793_v44 = vpop.f32.mrb[83].mxu1  ;;  %v1931_v60 = vadd.f32 %v1930_v20, %v3974_v2 }
 0x526   :  { %v1794_v34 = vadd.f32 %v1793_v44, %v4008_v55  ;;  %2270 = vst [vmem:[#allocation2 + $0x250] sm:$0xff] %v1929_v40 }
 0x527   :  { %2352 = vst [vmem:[#allocation2 + $0x4e0] sm:$0xff] %v1792_v51  ;;  %2271 = vst [vmem:[#allocation2 + $0x258] sm:$0xff] %v1931_v60  ;;  %v1934_v31 = vpop.f32.mrb[68].mxu0 }
 0x528   :  { %2353 = vst [vmem:[#allocation2 + $0x4e8] sm:$0xff] %v1794_v34  ;;  %v1797_v9 = vpop.f32.mrb[84].mxu1  ;;  %v1935_v63 = vadd.f32 %v1934_v31, %v3972_v1  ;;  %v1936_v35 = vpop.f32.mrb[69].mxu0 }
 0x529   :  { %v1798_v22 = vadd.f32 %v1797_v9, %v4014_v33  ;;  %v1799_v56 = vpop.f32.mrb[85].mxu1  ;;  %v1937_v3 = vadd.f32 %v1936_v35, %v3972_v1 }
 0x52a   :  { %v1800_v27 = vadd.f32 %v1799_v56, %v4014_v33  ;;  %2277 = vst [vmem:[#allocation2 + $0x288] sm:$0xff] %v1935_v63 }
 0x52b   :  { %2359 = vst [vmem:[#allocation2 + $0x518] sm:$0xff] %v1798_v22  ;;  %2278 = vst [vmem:[#allocation2 + $0x290] sm:$0xff] %v1937_v3  ;;  %v1940_v52 = vpop.f32.mrb[70].mxu0 }
 0x52c   :  { %2360 = vst [vmem:[#allocation2 + $0x520] sm:$0xff] %v1800_v27  ;;  %v2640_v15 = vpop.f32.mrb[86].mxu1  ;;  %v1941_v61 = vadd.f32 %v1940_v52, %v3980_v8  ;;  %v1942_v36 = vpop.f32.mrb[71].mxu0 }
 0x52d   :  { %v2083_v53 = vadd.f32 %v2640_v15, %v3937_v28  ;;  %v2077_v57 = vpop.f32.mrb[87].mxu1  ;;  %v1943_v59 = vadd.f32 %v1942_v36, %v3980_v8 }
 0x52e   :  { %v2078_v0 = vadd.f32 %v2077_v57, %v3939_v29  ;;  %2284 = vst [vmem:[#allocation2 + $0x2c0] sm:$0xff] %v1941_v61 }
 0x52f   :  { %2209 = vst.msk [vmem:[#allocation2 + $0x68] sm:$0xff] %vm134_vm0, %v2083_v53  ;;  %2285 = vst [vmem:[#allocation2 + $0x2c8] sm:$0xff] %v1943_v59  ;;  %v1946_v23 = vpop.f32.mrb[72].mxu0 }
 0x530   :  { %2202 = vst.msk [vmem:[#allocation2 + $0x30] sm:$0xff] %vm134_vm0, %v2078_v0  ;;  %v2643_v4 = vpop.f32.mrb[88].mxu1  ;;  %v1947_v5 = vadd.f32 %v1946_v23, %v3978_v46  ;;  %v1948_v48 = vpop.f32.mrb[73].mxu0 }
 0x531   :  { %v2093_v45 = vadd.f32 %v2643_v4, %v3948_v19  ;;  %v2087_v28 = vpop.f32.mrb[89].mxu1  ;;  %v1949_v11 = vadd.f32 %v1948_v48, %v3978_v46 }
 0x532   :  { %v2088_v12 = vadd.f32 %v2087_v28, %v3954_v62  ;;  %2291 = vst [vmem:[#allocation2 + $0x2f8] sm:$0xff] %v1947_v5 }
 0x533   :  { %2223 = vst.msk [vmem:[#allocation2 + $0xd8] sm:$0xff] %vm134_vm0, %v2093_v45  ;;  %2292 = vst [vmem:[#allocation2 + $0x300] sm:$0xff] %v1949_v11  ;;  %v1952_v29 = vpop.f32.mrb[74].mxu0 }
 0x534   :  { %2216 = vst.msk [vmem:[#allocation2 + $0xa0] sm:$0xff] %vm134_vm0, %v2088_v12  ;;  %v2646_v13 = vpop.f32.mrb[90].mxu1  ;;  %v1953_v26 = vadd.f32 %v1952_v29, %v3988_v43  ;;  %v1954_v42 = vpop.f32.mrb[75].mxu0 }
 0x535   :  { %v2103_v39 = vadd.f32 %v2646_v13, %v3956_v50  ;;  %v2097_v19 = vpop.f32.mrb[91].mxu1  ;;  %v1955_v6 = vadd.f32 %v1954_v42, %v3988_v43 }
 0x536   :  { %v2098_v16 = vadd.f32 %v2097_v19, %v3958_v7  ;;  %2298 = vst [vmem:[#allocation2 + $0x330] sm:$0xff] %v1953_v26 }
 0x537   :  { %2237 = vst.msk [vmem:[#allocation2 + $0x148] sm:$0xff] %vm134_vm0, %v2103_v39  ;;  %2299 = vst [vmem:[#allocation2 + $0x338] sm:$0xff] %v1955_v6  ;;  %v1958_v62 = vpop.f32.mrb[76].mxu0 }
 0x538   :  { %2230 = vst.msk [vmem:[#allocation2 + $0x110] sm:$0xff] %vm134_vm0, %v2098_v16  ;;  %v2649_v32 = vpop.f32.mrb[92].mxu1  ;;  %v1959_v14 = vadd.f32 %v1958_v62, %v3985_v30  ;;  %v1960_v21 = vpop.f32.mrb[77].mxu0 }
 0x539   :  { %v2113_v17 = vadd.f32 %v2649_v32, %v3960_v47  ;;  %v2107_v50 = vpop.f32.mrb[93].mxu1  ;;  %v1961_v24 = vadd.f32 %v1960_v21, %v3985_v30 }
 0x53a   :  { %v2108_v51 = vadd.f32 %v2107_v50, %v3962_v49  ;;  %2305 = vst [vmem:[#allocation2 + $0x368] sm:$0xff] %v1959_v14 }
 0x53b   :  { %2251 = vst.msk [vmem:[#allocation2 + $0x1b8] sm:$0xff] %vm134_vm0, %v2113_v17  ;;  %2306 = vst [vmem:[#allocation2 + $0x370] sm:$0xff] %v1961_v24  ;;  %v1964_v7 = vpop.f32.mrb[78].mxu0 }
 0x53c   :  { %2244 = vst.msk [vmem:[#allocation2 + $0x180] sm:$0xff] %vm134_vm0, %v2108_v51  ;;  %v2652_v40 = vpop.f32.mrb[94].mxu1  ;;  %v1965_v44 = vadd.f32 %v1964_v7, %v3992_v25  ;;  %v1966_v34 = vpop.f32.mrb[79].mxu0 }
 0x53d   :  { %v2123_v20 = vadd.f32 %v2652_v40, %v3966_v54  ;;  %v2117_v47 = vpop.f32.mrb[95].mxu1  ;;  %v1967_v60 = vadd.f32 %v1966_v34, %v3992_v25 }
 0x53e   :  { %v2118_v9 = vadd.f32 %v2117_v47, %v3968_v58  ;;  %2312 = vst [vmem:[#allocation2 + $0x3a0] sm:$0xff] %v1965_v44 }
 0x53f   :  { %2265 = vst.msk [vmem:[#allocation2 + $0x228] sm:$0xff] %vm134_vm0, %v2123_v20  ;;  %2313 = vst [vmem:[#allocation2 + $0x3a8] sm:$0xff] %v1967_v60  ;;  %v1970_v49 = vpop.f32.mrb[80].mxu0 }
 0x540   :  { %2258 = vst.msk [vmem:[#allocation2 + $0x1f0] sm:$0xff] %vm134_vm0, %v2118_v9  ;;  %v2655_v31 = vpop.f32.mrb[96].mxu1  ;;  %v1971_v22 = vadd.f32 %v1970_v49, %v3990_v37  ;;  %v1972_v56 = vpop.f32.mrb[81].mxu0 }
 0x541   :  { %v2133_v63 = vadd.f32 %v2655_v31, %v3972_v1  ;;  %v2127_v54 = vpop.f32.mrb[97].mxu1  ;;  %v1973_v35 = vadd.f32 %v1972_v56, %v3990_v37 }
 0x542   :  { %v2128_v27 = vadd.f32 %v2127_v54, %v3974_v2  ;;  %2319 = vst [vmem:[#allocation2 + $0x3d8] sm:$0xff] %v1971_v22 }
 0x543   :  { %2279 = vst.msk [vmem:[#allocation2 + $0x298] sm:$0xff] %vm134_vm0, %v2133_v63  ;;  %2320 = vst [vmem:[#allocation2 + $0x3e0] sm:$0xff] %v1973_v35  ;;  %v1976_v58 = vpop.f32.mrb[82].mxu0 }
 0x544   :  { %2272 = vst.msk [vmem:[#allocation2 + $0x260] sm:$0xff] %vm134_vm0, %v2128_v27  ;;  %v2658_v3 = vpop.f32.mrb[98].mxu1  ;;  %v1977_v52 = vadd.f32 %v1976_v58, %v3996_v38  ;;  %v1978_v61 = vpop.f32.mrb[83].mxu0 }
 0x545   :  { %v2143_v15 = vadd.f32 %v2658_v3, %v3978_v46  ;;  %v2137_v1 = vpop.f32.mrb[99].mxu1  ;;  %v1979_v53 = vadd.f32 %v1978_v61, %v3996_v38 }
 0x546   :  { %v2138_v36 = vadd.f32 %v2137_v1, %v3980_v8  ;;  %2326 = vst [vmem:[#allocation2 + $0x410] sm:$0xff] %v1977_v52 }
 0x547   :  { %2293 = vst.msk [vmem:[#allocation2 + $0x308] sm:$0xff] %vm134_vm0, %v2143_v15  ;;  %2327 = vst [vmem:[#allocation2 + $0x418] sm:$0xff] %v1979_v53  ;;  %v1982_v2 = vpop.f32.mrb[84].mxu0 }
 0x548   :  { %2286 = vst.msk [vmem:[#allocation2 + $0x2d0] sm:$0xff] %vm134_vm0, %v2138_v36  ;;  %v2661_v57 = vpop.f32.mrb[100].mxu1  ;;  %v1983_v59 = vadd.f32 %v1982_v2, %v3994_v41  ;;  %v1984_v23 = vpop.f32.mrb[85].mxu0 }
 0x549   :  { %v2153_v0 = vadd.f32 %v2661_v57, %v3985_v30  ;;  %v2147_v46 = vpop.f32.mrb[101].mxu1  ;;  %v1985_v4 = vadd.f32 %v1984_v23, %v3994_v41 }
 0x54a   :  { %v2148_v5 = vadd.f32 %v2147_v46, %v3988_v43  ;;  %2333 = vst [vmem:[#allocation2 + $0x448] sm:$0xff] %v1983_v59 }
 0x54b   :  { %2307 = vst.msk [vmem:[#allocation2 + $0x378] sm:$0xff] %vm134_vm0, %v2153_v0  ;;  %2334 = vst [vmem:[#allocation2 + $0x450] sm:$0xff] %v1985_v4  ;;  %v1988_v8 = vpop.f32.mrb[86].mxu0 }
 0x54c   :  { %2300 = vst.msk [vmem:[#allocation2 + $0x340] sm:$0xff] %vm134_vm0, %v2148_v5  ;;  %v2664_v45 = vpop.f32.mrb[102].mxu1  ;;  %v1989_v48 = vadd.f32 %v1988_v8, %v4000_v10  ;;  %v1990_v11 = vpop.f32.mrb[87].mxu0 }
 0x54d   :  { %v2163_v28 = vadd.f32 %v2664_v45, %v3990_v37  ;;  %v2157_v30 = vpop.f32.mrb[103].mxu1  ;;  %v1991_v12 = vadd.f32 %v1990_v11, %v4000_v10 }
 0x54e   :  { %v2158_v29 = vadd.f32 %v2157_v30, %v3992_v25  ;;  %2340 = vst [vmem:[#allocation2 + $0x480] sm:$0xff] %v1989_v48 }
 0x54f   :  { %2321 = vst.msk [vmem:[#allocation2 + $0x3e8] sm:$0xff] %vm134_vm0, %v2163_v28  ;;  %2341 = vst [vmem:[#allocation2 + $0x488] sm:$0xff] %v1991_v12  ;;  %v1994_v43 = vpop.f32.mrb[88].mxu0 }
 0x550   :  { %2314 = vst.msk [vmem:[#allocation2 + $0x3b0] sm:$0xff] %vm134_vm0, %v2158_v29  ;;  %v2667_v13 = vpop.f32.mrb[104].mxu1  ;;  %v1995_v26 = vadd.f32 %v1994_v43, %v4004_v18  ;;  %v1996_v42 = vpop.f32.mrb[89].mxu0 }
 0x551   :  { %v2173_v39 = vadd.f32 %v2667_v13, %v3994_v41  ;;  %v2167_v37 = vpop.f32.mrb[105].mxu1  ;;  %v1997_v19 = vadd.f32 %v1996_v42, %v4004_v18 }
 0x552   :  { %v2168_v6 = vadd.f32 %v2167_v37, %v3996_v38  ;;  %2347 = vst [vmem:[#allocation2 + $0x4b8] sm:$0xff] %v1995_v26 }
 0x553   :  { %2335 = vst.msk [vmem:[#allocation2 + $0x458] sm:$0xff] %vm134_vm0, %v2173_v39  ;;  %2348 = vst [vmem:[#allocation2 + $0x4c0] sm:$0xff] %v1997_v19  ;;  %v2000_v25 = vpop.f32.mrb[90].mxu0 }
 0x554   :  { %2328 = vst.msk [vmem:[#allocation2 + $0x420] sm:$0xff] %vm134_vm0, %v2168_v6  ;;  %v2670_v16 = vpop.f32.mrb[106].mxu1  ;;  %v2001_v62 = vadd.f32 %v2000_v25, %v4008_v55  ;;  %v2002_v14 = vpop.f32.mrb[91].mxu0 }
 0x555   :  { %v2183_v32 = vadd.f32 %v2670_v16, %v4004_v18  ;;  %v2177_v41 = vpop.f32.mrb[107].mxu1  ;;  %v2003_v17 = vadd.f32 %v2002_v14, %v4008_v55 }
 0x556   :  { %v2178_v21 = vadd.f32 %v2177_v41, %v4000_v10  ;;  %2354 = vst [vmem:[#allocation2 + $0x4f0] sm:$0xff] %v2001_v62 }
 0x557   :  { %2349 = vst.msk [vmem:[#allocation2 + $0x4c8] sm:$0xff] %vm134_vm0, %v2183_v32  ;;  %2355 = vst [vmem:[#allocation2 + $0x4f8] sm:$0xff] %v2003_v17  ;;  %v2006_v38 = vpop.f32.mrb[92].mxu0 }
 0x558   :  { %2342 = vst.msk [vmem:[#allocation2 + $0x490] sm:$0xff] %vm134_vm0, %v2178_v21  ;;  %v2673_v50 = vpop.f32.mrb[108].mxu1  ;;  %v2007_v24 = vadd.f32 %v2006_v38, %v4014_v33  ;;  %v2008_v51 = vpop.f32.mrb[93].mxu0 }
 0x559   :  { %v2193_v18 = vadd.f32 %v2673_v50, %v4014_v33  ;;  %v2187_v7 = vpop.f32.mrb[109].mxu1  ;;  %v2009_v40 = vadd.f32 %v2008_v51, %v4014_v33 }
 0x55a   :  { %v2188_v10 = vadd.f32 %v2187_v7, %v4008_v55  ;;  %2361 = vst [vmem:[#allocation2 + $0x528] sm:$0xff] %v2007_v24 }
 0x55b   :  { %2363 = vst.msk [vmem:[#allocation2 + $0x538] sm:$0xff] %vm134_vm0, %v2193_v18  ;;  %2362 = vst [vmem:[#allocation2 + $0x530] sm:$0xff] %v2009_v40 }
 0x55c   :  { %2356 = vst.msk [vmem:[#allocation2 + $0x500] sm:$0xff] %vm134_vm0, %v2188_v10 }
 0x55d   :  { %2836 = shalt.err (!%p2833_p4)
}
 0x55e   :  { %s2837_s10 = scalar_lea.hbm %s4205_s5, 21504 }
 0x55f   :  { %p2838_p5 = scmp.ne.s32.totalorder %s4205_s5, %s2837_s10  ;;  %p2841_p6 = scmp.lt.u32.totalorder %s2837_s10, %s4205_s5 }
 0x561   :  { %p2843_p7 = pnand %p2841_p6, %p2838_p5 }
 0x563   :  { %2846 = shalt.err (!%p2843_p7)
}
 0x564   :  { %s2852_s15 = smov 896   ;;  %s2853_s16 = smov 56  }
 0x565   :  { %2375 = dma.vmem_to_hbm [thread:$0]  %s2370_s6, 21504, %s4205_s5, [#allocation3], %s2852_s15, %s2852_s15, %s2853_s16  }
 0x566   :  { %2847 = dma.done.wait [#allocation3], 21504  }
 0x567   :  { %2848 = vsyncadd [#allocation3], 4294945792 }
 0x568   :  { %2379 = vsyncpa [#allocation3], 1 }

</bundles_post_ra>
